<compile_context>
chip_gen: v6e
topology: v6e:2x2x1
jax: 0.10.0
libtpu: 0.0.40
codegen_flags: <defaults>
</compile_context>

<pallas_src>
import math
from functools import partial
from itertools import chain

import jax
import jax.numpy as jnp
import numpy as np
from jax.experimental import pallas as pl
from jax.experimental.pallas import tpu as pltpu


def _fused_mhsa_stack_kernel(*refs, head_nums, att_dims):
    """One grid step = one batch tile; the FULL layer stack runs inside the kernel.

    refs = (x_ref, w_fused_0, ..., w_fused_{L-1}, o_ref)
      x_ref : (Bt, F, E0)          input activations (bf16)
      w_i   : (E_in_i, 4*E_out_i)  fused [Wq|Wk|Wv|Wres] (bf16)
      o_ref : (Bt, F, E_last)      output (fp32)
    """
    x_ref = refs[0]
    o_ref = refs[-1]
    w_refs = refs[1:-1]

    x = x_ref[...]                                           # (Bt, F, E0)
    Bt, F, _ = x.shape

    for i, w_ref in enumerate(w_refs):                       # static loop over layers
        H, D = head_nums[i], att_dims[i]
        E_out = H * D
        E_in = x.shape[-1]

        # One wide GEMM computes Q | K | V | res for the whole batch tile at once.
        x2d = x.reshape(Bt * F, E_in).astype(jnp.bfloat16)   # merge leading dims (free)
        w = w_ref[...]                                       # (E_in, 4*E_out) bf16
        proj = jnp.dot(x2d, w, preferred_element_type=jnp.float32)   # (Bt*F, 4*E_out) f32

        q = proj[:, 0 * E_out:1 * E_out].reshape(Bt, F, E_out).astype(jnp.bfloat16)
        k = proj[:, 1 * E_out:2 * E_out].reshape(Bt, F, E_out).astype(jnp.bfloat16)
        v = proj[:, 2 * E_out:3 * E_out].reshape(Bt, F, E_out).astype(jnp.bfloat16)
        res = proj[:, 3 * E_out:4 * E_out].reshape(Bt, F, E_out)     # fp32 residual path

        scale = 1.0 / math.sqrt(D)
        head_outs = []
        for h in range(H):                                   # static loop over heads
            sl = slice(h * D, (h + 1) * D)
            qh, kh, vh = q[:, :, sl], k[:, :, sl], v[:, :, sl]        # (Bt, F, D) bf16
            # batched scores over the whole batch tile: (Bt, F, F) fp32
            s = jax.lax.dot_general(
                qh, kh, (((2,), (2,)), ((0,), (0,))),
                preferred_element_type=jnp.float32) * scale
            s = s - jnp.max(s, axis=-1, keepdims=True)
            p = jnp.exp(s)
            inv = pl.reciprocal(jnp.sum(p, axis=-1, keepdims=True), approx=True)  # EUP
            p = (p * inv).astype(jnp.bfloat16)
            head_outs.append(jax.lax.dot_general(
                p, vh, (((2,), (1,)), ((0,), (0,))),
                preferred_element_type=jnp.float32))                   # (Bt, F, D)

        attn = head_outs[0] if H == 1 else jnp.concatenate(head_outs, axis=-1)
        x = jnp.maximum(attn + res, 0.0)                     # (Bt, F, E_out) fp32

    o_ref[...] = x.astype(o_ref.dtype)


def _pick_batch_tile(B, max_bt=256, min_steps=2):
    """Largest divisor of B that is <= max_bt and (if possible) leaves >= min_steps
    grid steps so v7x megacore has parallel work to shard."""
    bt = min(B, max_bt)
    if B >= min_steps:
        bt = min(bt, max(B // min_steps, 1))
    while B % bt:
        bt -= 1
    return max(bt, 1)


def multilayer_transformer_forward(x, fused_weights, head_nums, att_dims, *, batch_tile=None):
    B, F, E0 = x.shape
    bt = _pick_batch_tile(B) if batch_tile is None else batch_tile
    assert B % bt == 0
    E_last = head_nums[-1] * att_dims[-1]

    kernel = partial(_fused_mhsa_stack_kernel,
                     head_nums=tuple(head_nums), att_dims=tuple(att_dims))

    in_specs = [pl.BlockSpec((bt, F, E0), lambda b: (b, 0, 0))]
    for w in fused_weights:
        in_specs.append(pl.BlockSpec(w.shape, lambda b: (0, 0)))   # weights resident

    return pl.pallas_call(
        kernel,
        out_shape=jax.ShapeDtypeStruct((B, F, E_last), jnp.float32),
        grid=(B // bt,),
        in_specs=in_specs,
        out_specs=pl.BlockSpec((bt, F, E_last), lambda b: (b, 0, 0)),
        compiler_params=pltpu.CompilerParams(dimension_semantics=("parallel",)),
    )(x.astype(jnp.bfloat16), *fused_weights)


def default_hooker(userTrans, userFeature, itemFeature, itemTrans,
                   contextFeature, contextTrans):
    return list(chain(userTrans, itemTrans, contextTrans))


class MultiLayerTransformerPallas:
    """JAX/Pallas port of the MultiLayerTransformer fusion (deterministic weights)."""

    def __init__(self, featureNum, layerDims, headNum, key):
        self.featureNum = featureNum
        self.layerDims = layerDims
        self.headNum = headNum
        self.att_dims = [layerDims[i + 1] for i in range(len(layerDims) - 1)]
        self.fused_weights = []
        for i in range(len(layerDims) - 1):
            in_dim = layerDims[i] * headNum[i]
            out_dim = layerDims[i + 1] * headNum[i]
            key, kq, kk, kv, kr = jax.random.split(key, 5)
            scale = 1.0 / math.sqrt(in_dim)
            wq = jax.random.normal(kq, (in_dim, out_dim), jnp.float32) * scale
            wk = jax.random.normal(kk, (in_dim, out_dim), jnp.float32) * scale
            wv = jax.random.normal(kv, (in_dim, out_dim), jnp.float32) * scale
            wres = jax.random.normal(kr, (in_dim, out_dim), jnp.float32) * scale
            # Fused [Wq|Wk|Wv|Wres] stored in bf16: one wide GEMM input, half the DMA.
            self.fused_weights.append(
                jnp.concatenate([wq, wk, wv, wres], axis=1).astype(jnp.bfloat16))

    def _stack_tokens(self, userTrans, userFeature, itemFeature, itemTrans,
                      contextFeature, contextTrans):
        feature = default_hooker(userTrans, userFeature, itemFeature,
                                 itemTrans, contextFeature, contextTrans)
        assert len(feature) == self.featureNum
        return jnp.concatenate([f[:, None, :] for f in feature], axis=1)  # (B, F, E0)

    def __call__(self, userTrans, userFeature, itemFeature, itemTrans,
                 contextFeature, contextTrans):
        x = self._stack_tokens(userTrans, userFeature, itemFeature, itemTrans,
                               contextFeature, contextTrans)
        return multilayer_transformer_forward(
            x, self.fused_weights, self.headNum, self.att_dims)

    # Pure-JAX reference of the same math (same bf16 cast points as the kernel).
    def reference(self, userTrans, userFeature, itemFeature, itemTrans,
                  contextFeature, contextTrans):
        x = self._stack_tokens(userTrans, userFeature, itemFeature, itemTrans,
                               contextFeature, contextTrans)
        for i, wf in enumerate(self.fused_weights):
            H, D = self.headNum[i], self.att_dims[i]
            E_out = H * D
            B, F, E_in = x.shape
            proj = jnp.dot(x.reshape(B * F, E_in).astype(jnp.bfloat16), wf,
                           preferred_element_type=jnp.float32)
            q = proj[:, :E_out].reshape(B, F, H, D).transpose(0, 2, 1, 3)
            k = proj[:, E_out:2 * E_out].reshape(B, F, H, D).transpose(0, 2, 1, 3)
            v = proj[:, 2 * E_out:3 * E_out].reshape(B, F, H, D).transpose(0, 2, 1, 3)
            res = proj[:, 3 * E_out:].reshape(B, F, E_out)
            s = jnp.einsum("bhfd,bhgd->bhfg",
                           q.astype(jnp.bfloat16), k.astype(jnp.bfloat16),
                           preferred_element_type=jnp.float32) / math.sqrt(D)
            p = jax.nn.softmax(s, axis=-1)
            o = jnp.einsum("bhfg,bhgd->bhfd",
                           p.astype(jnp.bfloat16), v.astype(jnp.bfloat16),
                           preferred_element_type=jnp.float32)
            o = o.transpose(0, 2, 1, 3).reshape(B, F, E_out)
            x = jnp.maximum(o + res, 0.0)
        return x


if __name__ == "__main__":
    key = jax.random.PRNGKey(0)

    # Small config: 2 layers, 2 heads each, per-head dim 8 -> embedding dim 16.
    layerDims = [8, 8, 8]
    headNum = [2, 2]
    B = 16                                     # batch; tiled into >= 2 parallel grid steps
    emb = layerDims[0] * headNum[0]            # 16

    # hooker uses userTrans + itemTrans + contextTrans -> featureNum tokens
    key, *fk = jax.random.split(key, 9)
    userTrans = [jax.random.normal(fk[i], (B, emb), jnp.float32) for i in range(3)]
    itemTrans = [jax.random.normal(fk[3 + i], (B, emb), jnp.float32) for i in range(3)]
    contextTrans = [jax.random.normal(fk[6 + i], (B, emb), jnp.float32) for i in range(2)]
    userFeature, itemFeature, contextFeature = [], [], []   # unused by defaultHooker
    featureNum = len(userTrans) + len(itemTrans) + len(contextTrans)   # 8

    key, pkey = jax.random.split(key)
    model = MultiLayerTransformerPallas(featureNum, layerDims, headNum, pkey)

    out = model(userTrans, userFeature, itemFeature, itemTrans,
                contextFeature, contextTrans)
    out = jax.block_until_ready(out)

    ref = model.reference(userTrans, userFeature, itemFeature, itemTrans,
                          contextFeature, contextTrans)
    # bf16 MXU inputs + EUP approx reciprocal in the kernel softmax -> loose tolerance.
    np.testing.assert_allclose(np.asarray(out), np.asarray(ref), rtol=5e-2, atol=5e-2)

    print("KERNEL_OK")
</pallas_src>

<mosaic_0001>
module attributes {stable_mosaic.version = 11 : i64} {
  func.func @_fused_mhsa_stack_kernel(%arg0: i32, %arg1: memref<8x8x16xbf16, #tpu.memory_space<vmem>>, %arg2: memref<16x64xbf16, #tpu.memory_space<vmem>>, %arg3: memref<16x64xbf16, #tpu.memory_space<vmem>>, %arg4: memref<8x8x16xf32, #tpu.memory_space<vmem>>) attributes {dimension_semantics = [#tpu.dimension_semantics<parallel>], iteration_bounds = array<i64: 2>, scalar_prefetch = 0 : i64, scratch_operands = 0 : i64, tpu.core_type = #tpu.core_type<tc>, window_params = [{transform_indices = @transform_0, window_bounds = array<i64: 8, 8, 16>}, {pipeline_mode = #tpu.pipeline_mode<synchronous>, transform_indices = @transform_1, window_bounds = array<i64: 16, 64>}, {pipeline_mode = #tpu.pipeline_mode<synchronous>, transform_indices = @transform_2, window_bounds = array<i64: 16, 64>}, {transform_indices = @transform_3, window_bounds = array<i64: 8, 8, 16>}]} {
    %c0 = arith.constant 0 : index
    %c0_0 = arith.constant 0 : index
    %c0_1 = arith.constant 0 : index
    %0 = vector.load %arg1[%c0, %c0_0, %c0_1] : memref<8x8x16xbf16, #tpu.memory_space<vmem>>, vector<8x8x16xbf16>
    %1 = vector.shape_cast %0 : vector<8x8x16xbf16> to vector<64x16xbf16>
    %c0_2 = arith.constant 0 : index
    %c0_3 = arith.constant 0 : index
    %2 = vector.load %arg2[%c0_2, %c0_3] : memref<16x64xbf16, #tpu.memory_space<vmem>>, vector<16x64xbf16>
    %cst = arith.constant dense<0.000000e+00> : vector<64x64xf32>
    %3 = tpu.matmul %1, %2, %cst {dimension_numbers = #tpu.dot_dimension_numbers<[1], [0], [0], [1], [0, 0, 1, 1], [], []>} : vector<64x16xbf16>, vector<16x64xbf16>, vector<64x64xf32> -> vector<64x64xf32>
    %4 = vector.extract_strided_slice %3 {offsets = [0, 0], sizes = [64, 16], strides = [1, 1]} : vector<64x64xf32> to vector<64x16xf32>
    %5 = vector.shape_cast %4 : vector<64x16xf32> to vector<8x8x16xf32>
    %6 = arith.truncf %5 : vector<8x8x16xf32> to vector<8x8x16xbf16>
    %7 = vector.extract_strided_slice %3 {offsets = [0, 16], sizes = [64, 16], strides = [1, 1]} : vector<64x64xf32> to vector<64x16xf32>
    %8 = vector.shape_cast %7 : vector<64x16xf32> to vector<8x8x16xf32>
    %9 = arith.truncf %8 : vector<8x8x16xf32> to vector<8x8x16xbf16>
    %10 = vector.extract_strided_slice %3 {offsets = [0, 32], sizes = [64, 16], strides = [1, 1]} : vector<64x64xf32> to vector<64x16xf32>
    %11 = vector.shape_cast %10 : vector<64x16xf32> to vector<8x8x16xf32>
    %12 = arith.truncf %11 : vector<8x8x16xf32> to vector<8x8x16xbf16>
    %13 = vector.extract_strided_slice %3 {offsets = [0, 48], sizes = [64, 16], strides = [1, 1]} : vector<64x64xf32> to vector<64x16xf32>
    %14 = vector.shape_cast %13 : vector<64x16xf32> to vector<8x8x16xf32>
    %15 = vector.extract_strided_slice %6 {offsets = [0, 0, 0], sizes = [8, 8, 8], strides = [1, 1, 1]} : vector<8x8x16xbf16> to vector<8x8x8xbf16>
    %16 = vector.extract_strided_slice %9 {offsets = [0, 0, 0], sizes = [8, 8, 8], strides = [1, 1, 1]} : vector<8x8x16xbf16> to vector<8x8x8xbf16>
    %17 = vector.extract_strided_slice %12 {offsets = [0, 0, 0], sizes = [8, 8, 8], strides = [1, 1, 1]} : vector<8x8x16xbf16> to vector<8x8x8xbf16>
    %cst_4 = arith.constant dense<0.000000e+00> : vector<8x8x8xf32>
    %18 = tpu.matmul %15, %16, %cst_4 {dimension_numbers = #tpu.dot_dimension_numbers<[2], [2], [1], [1], [0, 0, 0, 1, 1, 1], [0], [0]>} : vector<8x8x8xbf16>, vector<8x8x8xbf16>, vector<8x8x8xf32> -> vector<8x8x8xf32>
    %cst_5 = arith.constant 0.353553385 : f32
    %19 = vector.broadcast %cst_5 : f32 to vector<8x8x8xf32>
    %20 = arith.mulf %18, %19 : vector<8x8x8xf32>
    %cst_6 = arith.constant dense<0xFF800000> : vector<8x8xf32>
    %21 = vector.multi_reduction <maximumf>, %20, %cst_6 [2] : vector<8x8x8xf32> to vector<8x8xf32>
    %22 = vector.shape_cast %21 : vector<8x8xf32> to vector<8x8x1xf32>
    %23 = vector.broadcast %22 : vector<8x8x1xf32> to vector<8x8x8xf32>
    %24 = arith.subf %20, %23 : vector<8x8x8xf32>
    %25 = math.exp %24 : vector<8x8x8xf32>
    %cst_7 = arith.constant dense<0.000000e+00> : vector<8x8xf32>
    %26 = vector.multi_reduction <add>, %25, %cst_7 [2] : vector<8x8x8xf32> to vector<8x8xf32>
    %27 = vector.shape_cast %26 : vector<8x8xf32> to vector<8x8x1xf32>
    %28 = tpu.reciprocal %27 {approx = true} : vector<8x8x1xf32> -> vector<8x8x1xf32>
    %29 = vector.broadcast %28 : vector<8x8x1xf32> to vector<8x8x8xf32>
    %30 = arith.mulf %25, %29 : vector<8x8x8xf32>
    %31 = arith.truncf %30 : vector<8x8x8xf32> to vector<8x8x8xbf16>
    %cst_8 = arith.constant dense<0.000000e+00> : vector<8x8x8xf32>
    %32 = tpu.matmul %31, %17, %cst_8 {dimension_numbers = #tpu.dot_dimension_numbers<[2], [1], [1], [2], [0, 0, 0, 1, 1, 2], [0], [0]>} : vector<8x8x8xbf16>, vector<8x8x8xbf16>, vector<8x8x8xf32> -> vector<8x8x8xf32>
    %33 = vector.extract_strided_slice %6 {offsets = [0, 0, 8], sizes = [8, 8, 8], strides = [1, 1, 1]} : vector<8x8x16xbf16> to vector<8x8x8xbf16>
    %34 = vector.extract_strided_slice %9 {offsets = [0, 0, 8], sizes = [8, 8, 8], strides = [1, 1, 1]} : vector<8x8x16xbf16> to vector<8x8x8xbf16>
    %35 = vector.extract_strided_slice %12 {offsets = [0, 0, 8], sizes = [8, 8, 8], strides = [1, 1, 1]} : vector<8x8x16xbf16> to vector<8x8x8xbf16>
    %cst_9 = arith.constant dense<0.000000e+00> : vector<8x8x8xf32>
    %36 = tpu.matmul %33, %34, %cst_9 {dimension_numbers = #tpu.dot_dimension_numbers<[2], [2], [1], [1], [0, 0, 0, 1, 1, 1], [0], [0]>} : vector<8x8x8xbf16>, vector<8x8x8xbf16>, vector<8x8x8xf32> -> vector<8x8x8xf32>
    %cst_10 = arith.constant 0.353553385 : f32
    %37 = vector.broadcast %cst_10 : f32 to vector<8x8x8xf32>
    %38 = arith.mulf %36, %37 : vector<8x8x8xf32>
    %cst_11 = arith.constant dense<0xFF800000> : vector<8x8xf32>
    %39 = vector.multi_reduction <maximumf>, %38, %cst_11 [2] : vector<8x8x8xf32> to vector<8x8xf32>
    %40 = vector.shape_cast %39 : vector<8x8xf32> to vector<8x8x1xf32>
    %41 = vector.broadcast %40 : vector<8x8x1xf32> to vector<8x8x8xf32>
    %42 = arith.subf %38, %41 : vector<8x8x8xf32>
    %43 = math.exp %42 : vector<8x8x8xf32>
    %cst_12 = arith.constant dense<0.000000e+00> : vector<8x8xf32>
    %44 = vector.multi_reduction <add>, %43, %cst_12 [2] : vector<8x8x8xf32> to vector<8x8xf32>
    %45 = vector.shape_cast %44 : vector<8x8xf32> to vector<8x8x1xf32>
    %46 = tpu.reciprocal %45 {approx = true} : vector<8x8x1xf32> -> vector<8x8x1xf32>
    %47 = vector.broadcast %46 : vector<8x8x1xf32> to vector<8x8x8xf32>
    %48 = arith.mulf %43, %47 : vector<8x8x8xf32>
    %49 = arith.truncf %48 : vector<8x8x8xf32> to vector<8x8x8xbf16>
    %cst_13 = arith.constant dense<0.000000e+00> : vector<8x8x8xf32>
    %50 = tpu.matmul %49, %35, %cst_13 {dimension_numbers = #tpu.dot_dimension_numbers<[2], [1], [1], [2], [0, 0, 0, 1, 1, 2], [0], [0]>} : vector<8x8x8xbf16>, vector<8x8x8xbf16>, vector<8x8x8xf32> -> vector<8x8x8xf32>
    %51 = tpu.concatenate %32, %50 in 2 : vector<8x8x8xf32>, vector<8x8x8xf32> -> vector<8x8x16xf32>
    %52 = arith.addf %51, %14 : vector<8x8x16xf32>
    %cst_14 = arith.constant 0.000000e+00 : f32
    %53 = vector.broadcast %cst_14 : f32 to vector<8x8x16xf32>
    %54 = arith.maximumf %52, %53 : vector<8x8x16xf32>
    %55 = vector.shape_cast %54 : vector<8x8x16xf32> to vector<64x16xf32>
    %56 = arith.truncf %55 : vector<64x16xf32> to vector<64x16xbf16>
    %c0_15 = arith.constant 0 : index
    %c0_16 = arith.constant 0 : index
    %57 = vector.load %arg3[%c0_15, %c0_16] : memref<16x64xbf16, #tpu.memory_space<vmem>>, vector<16x64xbf16>
    %cst_17 = arith.constant dense<0.000000e+00> : vector<64x64xf32>
    %58 = tpu.matmul %56, %57, %cst_17 {dimension_numbers = #tpu.dot_dimension_numbers<[1], [0], [0], [1], [0, 0, 1, 1], [], []>} : vector<64x16xbf16>, vector<16x64xbf16>, vector<64x64xf32> -> vector<64x64xf32>
    %59 = vector.extract_strided_slice %58 {offsets = [0, 0], sizes = [64, 16], strides = [1, 1]} : vector<64x64xf32> to vector<64x16xf32>
    %60 = vector.shape_cast %59 : vector<64x16xf32> to vector<8x8x16xf32>
    %61 = arith.truncf %60 : vector<8x8x16xf32> to vector<8x8x16xbf16>
    %62 = vector.extract_strided_slice %58 {offsets = [0, 16], sizes = [64, 16], strides = [1, 1]} : vector<64x64xf32> to vector<64x16xf32>
    %63 = vector.shape_cast %62 : vector<64x16xf32> to vector<8x8x16xf32>
    %64 = arith.truncf %63 : vector<8x8x16xf32> to vector<8x8x16xbf16>
    %65 = vector.extract_strided_slice %58 {offsets = [0, 32], sizes = [64, 16], strides = [1, 1]} : vector<64x64xf32> to vector<64x16xf32>
    %66 = vector.shape_cast %65 : vector<64x16xf32> to vector<8x8x16xf32>
    %67 = arith.truncf %66 : vector<8x8x16xf32> to vector<8x8x16xbf16>
    %68 = vector.extract_strided_slice %58 {offsets = [0, 48], sizes = [64, 16], strides = [1, 1]} : vector<64x64xf32> to vector<64x16xf32>
    %69 = vector.shape_cast %68 : vector<64x16xf32> to vector<8x8x16xf32>
    %70 = vector.extract_strided_slice %61 {offsets = [0, 0, 0], sizes = [8, 8, 8], strides = [1, 1, 1]} : vector<8x8x16xbf16> to vector<8x8x8xbf16>
    %71 = vector.extract_strided_slice %64 {offsets = [0, 0, 0], sizes = [8, 8, 8], strides = [1, 1, 1]} : vector<8x8x16xbf16> to vector<8x8x8xbf16>
    %72 = vector.extract_strided_slice %67 {offsets = [0, 0, 0], sizes = [8, 8, 8], strides = [1, 1, 1]} : vector<8x8x16xbf16> to vector<8x8x8xbf16>
    %cst_18 = arith.constant dense<0.000000e+00> : vector<8x8x8xf32>
    %73 = tpu.matmul %70, %71, %cst_18 {dimension_numbers = #tpu.dot_dimension_numbers<[2], [2], [1], [1], [0, 0, 0, 1, 1, 1], [0], [0]>} : vector<8x8x8xbf16>, vector<8x8x8xbf16>, vector<8x8x8xf32> -> vector<8x8x8xf32>
    %cst_19 = arith.constant 0.353553385 : f32
    %74 = vector.broadcast %cst_19 : f32 to vector<8x8x8xf32>
    %75 = arith.mulf %73, %74 : vector<8x8x8xf32>
    %cst_20 = arith.constant dense<0xFF800000> : vector<8x8xf32>
    %76 = vector.multi_reduction <maximumf>, %75, %cst_20 [2] : vector<8x8x8xf32> to vector<8x8xf32>
    %77 = vector.shape_cast %76 : vector<8x8xf32> to vector<8x8x1xf32>
    %78 = vector.broadcast %77 : vector<8x8x1xf32> to vector<8x8x8xf32>
    %79 = arith.subf %75, %78 : vector<8x8x8xf32>
    %80 = math.exp %79 : vector<8x8x8xf32>
    %cst_21 = arith.constant dense<0.000000e+00> : vector<8x8xf32>
    %81 = vector.multi_reduction <add>, %80, %cst_21 [2] : vector<8x8x8xf32> to vector<8x8xf32>
    %82 = vector.shape_cast %81 : vector<8x8xf32> to vector<8x8x1xf32>
    %83 = tpu.reciprocal %82 {approx = true} : vector<8x8x1xf32> -> vector<8x8x1xf32>
    %84 = vector.broadcast %83 : vector<8x8x1xf32> to vector<8x8x8xf32>
    %85 = arith.mulf %80, %84 : vector<8x8x8xf32>
    %86 = arith.truncf %85 : vector<8x8x8xf32> to vector<8x8x8xbf16>
    %cst_22 = arith.constant dense<0.000000e+00> : vector<8x8x8xf32>
    %87 = tpu.matmul %86, %72, %cst_22 {dimension_numbers = #tpu.dot_dimension_numbers<[2], [1], [1], [2], [0, 0, 0, 1, 1, 2], [0], [0]>} : vector<8x8x8xbf16>, vector<8x8x8xbf16>, vector<8x8x8xf32> -> vector<8x8x8xf32>
    %88 = vector.extract_strided_slice %61 {offsets = [0, 0, 8], sizes = [8, 8, 8], strides = [1, 1, 1]} : vector<8x8x16xbf16> to vector<8x8x8xbf16>
    %89 = vector.extract_strided_slice %64 {offsets = [0, 0, 8], sizes = [8, 8, 8], strides = [1, 1, 1]} : vector<8x8x16xbf16> to vector<8x8x8xbf16>
    %90 = vector.extract_strided_slice %67 {offsets = [0, 0, 8], sizes = [8, 8, 8], strides = [1, 1, 1]} : vector<8x8x16xbf16> to vector<8x8x8xbf16>
    %cst_23 = arith.constant dense<0.000000e+00> : vector<8x8x8xf32>
    %91 = tpu.matmul %88, %89, %cst_23 {dimension_numbers = #tpu.dot_dimension_numbers<[2], [2], [1], [1], [0, 0, 0, 1, 1, 1], [0], [0]>} : vector<8x8x8xbf16>, vector<8x8x8xbf16>, vector<8x8x8xf32> -> vector<8x8x8xf32>
    %cst_24 = arith.constant 0.353553385 : f32
    %92 = vector.broadcast %cst_24 : f32 to vector<8x8x8xf32>
    %93 = arith.mulf %91, %92 : vector<8x8x8xf32>
    %cst_25 = arith.constant dense<0xFF800000> : vector<8x8xf32>
    %94 = vector.multi_reduction <maximumf>, %93, %cst_25 [2] : vector<8x8x8xf32> to vector<8x8xf32>
    %95 = vector.shape_cast %94 : vector<8x8xf32> to vector<8x8x1xf32>
    %96 = vector.broadcast %95 : vector<8x8x1xf32> to vector<8x8x8xf32>
    %97 = arith.subf %93, %96 : vector<8x8x8xf32>
    %98 = math.exp %97 : vector<8x8x8xf32>
    %cst_26 = arith.constant dense<0.000000e+00> : vector<8x8xf32>
    %99 = vector.multi_reduction <add>, %98, %cst_26 [2] : vector<8x8x8xf32> to vector<8x8xf32>
    %100 = vector.shape_cast %99 : vector<8x8xf32> to vector<8x8x1xf32>
    %101 = tpu.reciprocal %100 {approx = true} : vector<8x8x1xf32> -> vector<8x8x1xf32>
    %102 = vector.broadcast %101 : vector<8x8x1xf32> to vector<8x8x8xf32>
    %103 = arith.mulf %98, %102 : vector<8x8x8xf32>
    %104 = arith.truncf %103 : vector<8x8x8xf32> to vector<8x8x8xbf16>
    %cst_27 = arith.constant dense<0.000000e+00> : vector<8x8x8xf32>
    %105 = tpu.matmul %104, %90, %cst_27 {dimension_numbers = #tpu.dot_dimension_numbers<[2], [1], [1], [2], [0, 0, 0, 1, 1, 2], [0], [0]>} : vector<8x8x8xbf16>, vector<8x8x8xbf16>, vector<8x8x8xf32> -> vector<8x8x8xf32>
    %106 = tpu.concatenate %87, %105 in 2 : vector<8x8x8xf32>, vector<8x8x8xf32> -> vector<8x8x16xf32>
    %107 = arith.addf %106, %69 : vector<8x8x16xf32>
    %cst_28 = arith.constant 0.000000e+00 : f32
    %108 = vector.broadcast %cst_28 : f32 to vector<8x8x16xf32>
    %109 = arith.maximumf %107, %108 : vector<8x8x16xf32>
    %c0_29 = arith.constant 0 : index
    %c0_30 = arith.constant 0 : index
    %c0_31 = arith.constant 0 : index
    %110 = vector.load %arg4[%c0_29, %c0_30, %c0_31] : memref<8x8x16xf32, #tpu.memory_space<vmem>>, vector<8x8x16xf32>
    tpu.vector_store %arg4[%c0_29, %c0_30, %c0_31], %109 {strides = array<i32>} : memref<8x8x16xf32, #tpu.memory_space<vmem>>, vector<8x8x16xf32>,
    return
  }
  func.func @transform_0(%arg0: i32) -> (i32, i32, i32) {
    %c0_i32 = arith.constant 0 : i32
    %c0_i32_0 = arith.constant 0 : i32
    %c0_i32_1 = arith.constant 0 : i32
    return %arg0, %c0_i32, %c0_i32_0 : i32, i32, i32
  }
  func.func @transform_1(%arg0: i32) -> (i32, i32) {
    %c0_i32 = arith.constant 0 : i32
    %c0_i32_0 = arith.constant 0 : i32
    %c0_i32_1 = arith.constant 0 : i32
    return %c0_i32, %c0_i32_0 : i32, i32
  }
  func.func @transform_2(%arg0: i32) -> (i32, i32) {
    %c0_i32 = arith.constant 0 : i32
    %c0_i32_0 = arith.constant 0 : i32
    %c0_i32_1 = arith.constant 0 : i32
    return %c0_i32, %c0_i32_0 : i32, i32
  }
  func.func @transform_3(%arg0: i32) -> (i32, i32, i32) {
    %c0_i32 = arith.constant 0 : i32
    %c0_i32_0 = arith.constant 0 : i32
    %c0_i32_1 = arith.constant 0 : i32
    return %arg0, %c0_i32, %c0_i32_0 : i32, i32, i32
  }
}

</mosaic_0001>

<bundles_post_ra>
// kernel: tpu_custom_call.1
= control target key start
LH: loop header
LB: loop body
LE: loop exit
PB: predicated region body
PF: predicated region fallthrough
CT: control target
= control target key end

     0   :  { %8 = vsyncpa [#allocation3], 0  ;;  %s6470_s0 = inlined_call_operand.hbm [shape: bf16[16,8,16], index: 0, kind: input, shape index: {}]   ;;  %s6471_s1 = inlined_call_operand.hbm [shape: bf16[16,64], index: 1, kind: input, shape index: {}]   ;;  %s6472_s2 = inlined_call_operand.hbm [shape: bf16[16,64], index: 2, kind: input, shape index: {}]   ;;  %s6473_s3 = inlined_call_operand.hbm [shape: f32[16,8,16], index: 3, kind: output, shape index: {}]  }
   0x1   :  { %10 = vsyncpa [#allocation3 + $0x1], 0 }
   0x2   :  { %11 = vsyncpa [#allocation6], 0 }
   0x3   :  { %12 = vsyncpa [#allocation4], 0 }
   0x4   :  { %14 = vsyncpa [#allocation4 + $0x1], 0  ;;  %s5307_s12 = smov 0   ;;  %s5309_s13 = smov 0  }
   0x5   :  { %s5311_s14 = smov 0   ;;  %s5313_s15 = smov 0  }
   0x6 LB: > { %s5328_s16 = sadd.s32 4294967295, %s5269_s15   ;;  %s4268_s17 = sadd.s32 4294967294, %s5269_s15   ;;  %s5269_s15 = sphi %s5313_s15, %s6494_s15   ;;  %s5265_s14 = sphi %s5311_s14, %s6493_s14   ;;  %s5261_s13 = sphi %s5309_s13, %s6492_s13   ;;  %s5257_s12 = sphi %s5307_s12, %s6491_s12  }
   0x7   : > { %p40_p0 = scmp.ne.s32.totalorder %s5261_s13, %s5257_s12  ;;  %p6474_p1 = scmp.eq.s32.totalorder %s5328_s16, 0 }
   0x8   : > { %p106_p2 = scmp.eq.s32.totalorder %s5328_s16, 1  ;;  %p112_p3 = scmp.eq.s32.totalorder %s4268_s17, 1 }
   0x9   : > { %p5337_p4 = por %p6474_p1, %p40_p0  ;;  %p4269_p5 = scmp.ge.s32.totalorder %s5269_s15, 1 }
   0xa   : > { %p5342_p6 = por %p112_p3, %p40_p0  ;;  %p119_p7 = scmp.lt.s32.totalorder %s5269_s15, 3 }
   0xb   : > { %s6478_s18 = scalar_select %p5337_p4, 1, 0 }
   0xc   : > { %s6479_s19 = scalar_select %p5342_p6, 1, 0 }
   0xd   : > { %p5347_p8 = pnand %p4269_p5, %p119_p7  ;;  %s5271_s21 = smov [#allocation5]  }
   0xe   : > { %s131_s22 = sshll.u32 %s5271_s21, 4  ;;  %s5272_s24 = smov [#allocation7]   ;;  %s132_s22 = int_to_ptr.vmem [resolvable:$true] %s131_s22 }
   0xf   : > { %s6480_s20 = scalar_select %p5347_p8, 1, 0 }
  0x10   : > { %p4920_p9 = pneg %p5347_p8  ;;  %s144_s25 = sshll.u32 %s5272_s24, 4  ;;  %s145_s25 = int_to_ptr.vmem [resolvable:$true] %s144_s25 }
  0x11   : > { %s5132_s26 = scalar_lea.vmem %s132_s22, 128  ;;  %p5140_p5 = scmp.lt.s32.totalorder %s132_s22, %s132_s22 }
  0x12   : > { %p5356_p11 = pnand %p4920_p9, %p6474_p1  ;;  %p5133_p13 = scmp.ne.s32.totalorder %s132_s22, %s5132_s26 }
  0x13   : > { %p5141_p7 = scmp.lt.s32.totalorder %s5132_s26, %s5132_s26 }
  0x14   : > { %p5123_p12 = pneg %p5356_p11 }
  0x15   : > { %p5142_p10 = por %p5141_p7, %p5140_p5 }
  0x16   : > { %p5135_p0 = pnand %p5133_p13, %p5123_p12 }
  0x18   : > { %p5136_p3 = pneg %p5135_p0 }
  0x1a   : > { %p5143_p9 = pnand %p5142_p10, %p5136_p3 }
  0x1c   : > { %5146 = shalt.err (!%p5143_p9)
}
  0x1d   : > { %s5273_s27 = smov 64   ;;  %s5274_s28 = smov 4  }
  0x1e   : > { %4923 = dma.hbm_to_vmem [thread:$0]  (!%p5356_p11), %s6471_s1, 128, %s132_s22, [#allocation6], %s5273_s27, %s5273_s27, %s5274_s28  }
  0x1f   : > { %s5158_s4 = scalar_lea.vmem %s145_s25, 128  ;;  %p5166_p10 = scmp.lt.s32.totalorder %s145_s25, %s145_s25 }
  0x20   : > { %p5159_p13 = scmp.ne.s32.totalorder %s145_s25, %s5158_s4  ;;  %p5167_p3 = scmp.lt.s32.totalorder %s5158_s4, %s5158_s4 }
  0x22   : > { %p5161_p0 = pnand %p5159_p13, %p5123_p12  ;;  %p5168_p7 = por %p5167_p3, %p5166_p10 }
  0x24   : > { %p5162_p5 = pneg %p5161_p0 }
  0x26   : > { %p5169_p9 = pnand %p5168_p7, %p5162_p5 }
  0x28   : > { %5172 = shalt.err (!%p5169_p9)
}
  0x29   : > { %4926 = dma.hbm_to_vmem [thread:$0]  (!%p5356_p11), %s6472_s2, 128, %s145_s25, [#allocation6], %s5273_s27, %s5273_s27, %s5274_s28  }
  0x2a   : > { %s5385_s7 = sadd.s32 1, %s5269_s15   ;;  %s27_s8 = sadd.s32 1, %s5265_s14 }
  0x2b   : > { %s24_s9 = ssub.s32 %s5269_s15, %s5385_s7  ;;  %p34_p12 = scmp.ne.s32.totalorder %s5265_s14, %s5261_s13 }
  0x2c   : > { %p25_p13 = scmp.eq.s32.totalorder %s24_s9, 0  ;;  %p35_p0 = scmp.eq.s32.totalorder %s5269_s15, 0 }
  0x2d   : > { %p5395_p5 = por %p106_p2, %p34_p12  ;;  %p4937_p10 = scmp.lt.s32.totalorder %s5269_s15, 2 }
  0x2e   : > { %s5401_s11 = scalar_select %p25_p13, %s5265_s14, %s27_s8  }
  0x2f   : > { %s6482_s10 = scalar_select %p5395_p5, 1, 0 }
  0x30   : > { %p36_p3 = por %p35_p0, %p34_p12  ;;  %s158_s17 = sand.u32 1, %s5265_s14  }
  0x31   : > { %s4273_s21 = sshll.u32 %s158_s17, 5  ;;  %s4364_s22 = sshll.u32 %s5269_s15, 9 }
  0x32   : > { %s5408_s25 = scalar_lea.hbm %s6470_s0, %s4364_s22  ;;  %s162_s26 = scalar_lea.vmem [#allocation2], %s4273_s21 }
  0x33   : > { %s169_s29 = sshll.u32 %s162_s26, 4  ;;  %p5412_p2 = pnand %p4937_p10, %p36_p3  ;;  %s5410_s29 = int_to_ptr.vmem [resolvable:$true] %s169_s29 }
  0x34   : > { %s5416_s4 = scalar_lea.sflag [#allocation3], %s158_s17  ;;  %s5173_s5 = scalar_lea.hbm %s5408_s25, 512 }
  0x35   : > { %p5174_p11 = scmp.ne.s32.totalorder %s5408_s25, %s5173_s5  ;;  %p5175_p7 = pneg %p5412_p2 }
  0x36   : > { %s5178_s9 = scalar_lea.hbm %s6470_s0, 1024  ;;  %p5179_p13 = scmp.lt.s32.totalorder %s5408_s25, %s6470_s0 }
  0x37   : > { %p5176_p9 = pnand %p5175_p7, %p5174_p11  ;;  %p5180_p0 = scmp.lt.s32.totalorder %s5178_s9, %s5173_s5 }
  0x39   : > { %p5177_p12 = pneg %p5176_p9  ;;  %p5181_p10 = por %p5180_p0, %p5179_p13 }
  0x3b   : > { %p5182_p3 = pnand %p5181_p10, %p5177_p12 }
  0x3d   : > { %5185 = shalt.err (!%p5182_p3)
}
  0x3e   : > { %s5186_s17 = scalar_lea.vmem %s5410_s29, 512  ;;  %s5275_s23 = smov [#allocation2]  }
  0x3f   : > { %p5187_p1 = scmp.ne.s32.totalorder %s5410_s29, %s5186_s17  ;;  %s5191_s24 = sshll.u32 %s5275_s23, 4  ;;  %s5192_s24 = int_to_ptr.vmem [resolvable:$false] %s5191_s24 }
  0x40   : > { %s5193_s26 = scalar_lea.vmem %s5192_s24, 1024  ;;  %p5194_p9 = scmp.lt.s32.totalorder %s5410_s29, %s5192_s24 }
  0x41   : > { %p5189_p6 = pnand %p5187_p1, %p5175_p7  ;;  %p5195_p5 = scmp.lt.s32.totalorder %s5193_s26, %s5186_s17 }
  0x43   : > { %p5190_p11 = pneg %p5189_p6  ;;  %p5196_p4 = por %p5195_p5, %p5194_p9 }
  0x45   : > { %p5197_p8 = pnand %p5196_p4, %p5190_p11 }
  0x47   : > { %5200 = shalt.err (!%p5197_p8)
}
  0x48   : > { %4930 = dma.hbm_to_vmem [thread:$0]  (!%p5412_p2), %s5408_s25, 512, %s5410_s29, %s5416_s4, %s5273_s27, %s5273_s27, %s5274_s28  }
  0x49   : > { %p6484_p1 = scmp.ne.s32.totalorder %s6480_s20, 0 }
  0x4a   : > { %s5443_s5 = sand.u32 (!%p6484_p1), 1, %s5261_s13   ;;  %p6485_p4 = scmp.ne.s32.totalorder (!%p6484_p1), %s6478_s18, 0 }
  0x4b   : > { %181 = sbr.rel (%p6484_p1) target bundleno = 3701 (0xe75), region = 32  ;;  %s4277_s6 = sshll.u32 (!%p6484_p1), %s5443_s5, 5 }
  0x4c   : > { %s184_s8 = scalar_lea.sflag (!%p6484_p1), [#allocation3], %s5443_s5  ;;  %s187_s9 = scalar_lea.vmem (!%p6484_p1), [#allocation2], %s4277_s6 }
  0x50   : > { %5244 = dma.done.wait (%p6485_p4), %s184_s8, 512  }
  0x51   : > { %5246 = vsyncadd (%p6485_p4), %s184_s8, 4294966784  ;;  %p6486_p6 = scmp.eq.s32.totalorder %s5328_s16, 0 }
  0x53   : > { %5248 = dma.done.wait (%p6486_p6), [#allocation6], 256   ;;  %p6487_p8 = pmov %p6486_p6 }
  0x54   : > { %v4987_v0 = vld [vmem:[#allocation5] sm:$0xff]   ;;  %vm257_vm0 = vcmask 130048   ;;  %v4989_v2 = vld [vmem:[%s187_s9 + $0x8] sm:$0xff]   ;;  %v4990_v3 = vld [vmem:[%s187_s9 + $0x10] sm:$0xff]   ;;  %v5276_v5 = vmov 0.0   ;;  %vm5277_vm1 = vmmov 0  }
  0x55   : > { %5250 = vsyncadd (%p6487_p8), [#allocation6], 4294967040  ;;  %v4988_v1 = vld [vmem:[%s187_s9] sm:$0xff]   ;;  %4504 = vmatprep.subr.bf16.mxu0 %v4987_v0  ;;  %v4991_v4 = vld [vmem:[%s187_s9 + $0x18] sm:$0xff]   ;;  %4514 = vmatprep.subr.bf16.mxu1 %v5276_v5  ;;  %s5278_s18 = smov 112   ;;  %s5279_s20 = smov 96  }
  0x56   : > { %4505 = vmatpush3.bf16.msra.mxu0 %v4987_v0  ;;  %4506 = vmatprep.mubr.msk.bf16.mxu0 %vm257_vm0, %v4988_v1  ;;  %vm346_vm2 = vcmask 64512   ;;  %vm845_vm3 = vcmask 1043456   ;;  %s5280_s27 = smov 104   ;;  %s5281_s28 = smov 120  }
  0x57   : > { %4526 = vmatprep.subr.bf16.mxu0 %v5276_v5  ;;  %4516 = vmatprep.mubr.msk.bf16.mxu1 %vm5277_vm1, %v5276_v5  ;;  %s5282_s25 = smov 88   ;;  %s5283_s29 = smov 80  }
  0x58   : > { %s5284_s30 = smov 8   ;;  %s4280_s4 = sshll.u32 %s5443_s5, 6 }
  0x59   : > { %4507 = vmatmul.mubr.msk.bf16.vlgmr.msra.gmra.mxu0 %vm257_vm0, %v4989_v2  ;;  %s6389_s21 = scalar_lea.vmem [#allocation8], %s4280_s4  ;;  %s4365_s22 = sshll.u32 %s5328_s16, 10 }
  0x5a   : > { %4510 = vmatprep.mubr.msk.bf16.mxu0 %vm257_vm0, %v4990_v3  ;;  %s4176_s17 = sshll.u32 %s6389_s21, 4  ;;  %s6422_s26 = scalar_lea.hbm %s6473_s3, %s4365_s22  ;;  %s6424_s17 = int_to_ptr.vmem [resolvable:$true] %s4176_s17 }
  0x5b   : > { %s4163_s16 = scalar_lea.sflag [#allocation4], %s5443_s5  ;;  %s5201_s6 = scalar_lea.vmem %s6424_s17, 1024 }
  0x5c   : > { %p5202_p5 = scmp.ne.s32.totalorder %s6424_s17, %s5201_s6  ;;  %p6488_p2 = scmp.ne.s32.totalorder %s6482_s10, 0 }
  0x5d   : > { %s5285_s8 = smov [#allocation8]  }
  0x5e   : > { %p5203_p7 = pnand %p5202_p5, %p6488_p2  ;;  %s5205_s9 = sshll.u32 %s5285_s8, 4  ;;  %s5206_s9 = int_to_ptr.vmem [resolvable:$false] %s5205_s9 }
  0x5f   : > { %p5208_p13 = scmp.lt.s32.totalorder %s6424_s17, %s5206_s9 }
  0x60   : > { %p5204_p12 = pneg %p5203_p7 }
  0x61   : > { %4511 = vmatmul.mubr.msk.bf16.gmra.mxu0 %vm257_vm0, %v4991_v4 }
  0x62   : > { %4528 = vmatprep.mubr.msk.bf16.mxu0 %vm5277_vm1, %v5276_v5 }
 0x119   : > { %v5465_v6 = vpop.f32.mrf.mxu0 }
 0x11a   : > { %v5469_v7 = vpack.c.bf16 %v5465_v6, %v5465_v6 }
 0x11b   : > { %v5471_v8 = vpop.f32.mrf.mxu0 }
 0x11c   : > { %v5475_v9 = vpack.c.bf16 %v5471_v8, %v5471_v8  ;;  %443 = vrot.lane.b32.xlu1 %v5469_v7, %s5278_s18 }
 0x11d   : > { %v5479_v10 = vpop.f32.mrf.mxu0 }
 0x11e   : > { %v5483_v11 = vpack.c.bf16 %v5479_v10, %v5479_v10  ;;  %344 = vrot.lane.b32.xlu0 %v5475_v9, %s5278_s18 }
 0x11f   : > { %v5487_v12 = vpop.f32.mrf.mxu0 }
 0x120   : > { %v5491_v13 = vpack.c.bf16 %v5487_v12, %v5487_v12  ;;  %492 = vrot.lane.b32.xlu1 %v5483_v11, %s5278_s18 }
 0x121   : > { %v5495_v14 = vpop.f32.mrf.mxu0 }
 0x122   : > { %394 = vrot.lane.b32.xlu0 %v5491_v13, %s5278_s18  ;;  %v5509_v18 = vpack.c.bf16 %v5495_v14, %v5495_v14 }
 0x123   : > { %v5499_v15 = vpop.f32.mrf.mxu0 }
 0x124   : > { %v5503_v16 = vpack.c.bf16 %v5499_v15, %v5499_v15 }
 0x125   : > { %v5505_v17 = vpop.f32.mrf.mxu0 }
 0x126   : > { %541 = vrot.lane.b32.xlu0 %v5503_v16, %s5278_s18  ;;  %v5521_v21 = vpack.c.bf16 %v5505_v17, %v5505_v17 }
 0x127   : > { %v5513_v19 = vpop.f32.mrf.mxu0 }
 0x128   : > { %v5517_v20 = vpack.c.bf16 %v5513_v19, %v5513_v19 }
 0x12a   : > { %639 = vrot.lane.b32.xlu0 %v5509_v18, %s5278_s18  ;;  %590 = vrot.lane.b32.xlu1 %v5517_v20, %s5278_s18 }
 0x12e   : > { %889 = vrot.lane.b32.xlu0 %v5491_v13, %s5279_s20  ;;  %688 = vrot.lane.b32.xlu1 %v5521_v21, %s5278_s18 }
 0x132   : > { %840 = vrot.lane.b32.xlu1 %v5475_v9, %s5279_s20 }
 0x136   : > { %937 = vrot.lane.b32.xlu1 %v5469_v7, %s5279_s20 }
 0x18e   : > { %v444_v22 = vpop.permute.xlu1 %443 }
 0x18f   : > { %v449_v23 = vsel %vm346_vm2, %v444_v22, 0 }
 0x190   : > { %4527 = vmatpush3.bf16.xpose.msra.mxu0 %v449_v23  ;;  %v345_v24 = vpop.permute.xlu0 %344 }
 0x191   : > { %v351_v25 = vsel %vm346_vm2, %v345_v24, 0  ;;  %4538 = vmatprep.subr.bf16.mxu0 %v5276_v5 }
 0x192   : > { %4515 = vmatpush3.bf16.xpose.msra.mxu1 %v351_v25  ;;  %v493_v27 = vpop.permute.xlu1 %492 }
 0x193   : > { %4520 = vmatprep.subr.bf16.mxu1 %v5276_v5  ;;  %v498_v35 = vsel %vm346_vm2, %v493_v27, 0 }
 0x194   : > { %v395_v26 = vpop.permute.xlu0 %394 }
 0x195   : > { %v400_v29 = vsel %vm346_vm2, %v395_v26, 0 }
 0x197   : > { %4529 = vmatmul.mubr.msk.bf16.vlgmr.msra.gmra.mxu0 %vm346_vm2, %v5469_v7 }
 0x198   : > { %v542_v28 = vpop.permute.xlu0 %541  ;;  %4540 = vmatprep.mubr.msk.bf16.mxu0 %vm5277_vm1, %v5276_v5 }
 0x199   : > { %v547_v30 = vsel %vm346_vm2, %v542_v28, 0  ;;  %4517 = vmatmul.mubr.msk.bf16.vlgmr.msra.gmra.mxu1 %vm346_vm2, %v5475_v9 }
 0x19a   : > { %4521 = vmatpush3.bf16.xpose.msra.mxu1 %v400_v29  ;;  %4539 = vmatpush3.bf16.xpose.msra.mxu0 %v547_v30 }
 0x19b   : > { %4522 = vmatprep.mubr.msk.bf16.mxu1 %vm5277_vm1, %v5276_v5  ;;  %4532 = vmatprep.subr.bf16.mxu1 %v5276_v5 }
 0x19c   : > { %v591_v31 = vpop.permute.xlu1 %590  ;;  %4550 = vmatprep.subr.bf16.mxu0 %v5276_v5  ;;  %v640_v32 = vpop.permute.xlu0 %639 }
 0x19d   : > { %v645_v33 = vsel %vm346_vm2, %v640_v32, 0  ;;  %v596_v37 = vsel %vm346_vm2, %v591_v31, 0 }
 0x1a0   : > { %v689_v34 = vpop.permute.xlu1 %688  ;;  %v890_v40 = vpop.permute.xlu0 %889 }
 0x1a1   : > { %4523 = vmatmul.mubr.msk.bf16.vlgmr.msra.gmra.mxu1 %vm346_vm2, %v5491_v13  ;;  %4541 = vmatmul.mubr.msk.bf16.vlgmr.msra.gmra.mxu0 %vm346_vm2, %v5503_v16  ;;  %v694_v39 = vsel %vm346_vm2, %v689_v34, 0  ;;  %v895_v41 = vsel %vm845_vm3, %v890_v40, 0 }
 0x1a2   : > { %4533 = vmatpush3.bf16.xpose.msra.mxu1 %v498_v35  ;;  %4551 = vmatpush3.bf16.xpose.msra.mxu0 %v645_v33 }
 0x1a3   : > { %4534 = vmatprep.mubr.msk.bf16.mxu1 %vm5277_vm1, %v5276_v5  ;;  %4552 = vmatprep.mubr.msk.bf16.mxu0 %vm5277_vm1, %v5276_v5 }
 0x1a4   : > { %4544 = vmatprep.subr.bf16.mxu1 %v5276_v5  ;;  %4562 = vmatprep.subr.bf16.mxu0 %v5276_v5  ;;  %v841_v36 = vpop.permute.xlu1 %840 }
 0x1a5   : > { %v847_v38 = vsel %vm845_vm3, %v841_v36, 0 }
 0x1a9   : > { %4535 = vmatmul.mubr.msk.bf16.vlgmr.msra.gmra.mxu1 %vm346_vm2, %v5483_v11  ;;  %4553 = vmatmul.mubr.msk.bf16.vlgmr.msra.gmra.mxu0 %vm346_vm2, %v5509_v18 }
 0x1aa   : > { %4545 = vmatpush3.bf16.xpose.msra.mxu1 %v596_v37  ;;  %4563 = vmatpush3.bf16.msra.mxu0 %v847_v38 }
 0x1ab   : > { %4546 = vmatprep.mubr.msk.bf16.mxu1 %vm5277_vm1, %v5276_v5  ;;  %4556 = vmatprep.subr.bf16.mxu1 %v5276_v5 }
 0x1ac   : > { %4564 = vmatprep.mubr.msk.bf16.mxu0 %vm5277_vm1, %v5276_v5  ;;  %4574 = vmatprep.subr.bf16.mxu0 %v5276_v5 }
 0x1b1   : > { %4547 = vmatmul.mubr.msk.bf16.vlgmr.msra.gmra.mxu1 %vm346_vm2, %v5517_v20 }
 0x1b2   : > { %4557 = vmatpush3.bf16.xpose.msra.mxu1 %v694_v39  ;;  %4558 = vmatprep.mubr.msk.bf16.mxu1 %vm5277_vm1, %v5276_v5 }
 0x1b3   : > { %4568 = vmatprep.subr.bf16.mxu1 %v5276_v5 }
 0x1b9   : > { %4559 = vmatmul.mubr.msk.bf16.vlgmr.msra.gmra.mxu1 %vm346_vm2, %v5521_v21 }
 0x1ba   : > { %4569 = vmatpush3.bf16.msra.mxu1 %v895_v41  ;;  %4570 = vmatprep.mubr.msk.bf16.mxu1 %vm5277_vm1, %v5276_v5 }
 0x1bb   : > { %4580 = vmatprep.subr.bf16.mxu1 %v5276_v5 }
 0x257   : > { %v485_v42 = vpop.f32.mrf.mxu0 }
 0x258   : > { %v738_v43 = vmul.f32 0.35355338, %v485_v42 }
 0x259   : > { %v387_v44 = vpop.f32.mrf.mxu1  ;;  %v4530_v45 = vpop.f32.mrf.mxu0 }
 0x25a   : > { %v736_v46 = vmul.f32 0.35355338, %v387_v44  ;;  %v750_v47 = vsel %vm346_vm2, %v738_v43, -inf }
 0x25b   : > { %v4518_v48 = vpop.f32.mrf.mxu1  ;;  %751 = vmax.xlane.f32.xlu0 %v750_v47  ;;  %v488_v49 = vpop.f32.mrf.mxu0 }
 0x25c   : > { %v744_v52 = vsel %vm346_vm2, %v736_v46, -inf }
 0x25d   : > { %v390_v50 = vpop.f32.mrf.mxu1  ;;  %v4531_v51 = vpop.f32.mrf.mxu0 }
 0x25e   : > { %v5605_v50 = vpop.permute.xlu1 %937 }
 0x25f   : > { %v4519_v53 = vpop.f32.mrf.mxu1  ;;  %745 = vmax.xlane.f32.xlu0 %v744_v52 }
 0x261   : > { %v436_v54 = vpop.f32.mrf.mxu1  ;;  %v583_v55 = vpop.f32.mrf.mxu0 }
 0x262   : > { %v737_v56 = vmul.f32 0.35355338, %v436_v54  ;;  %v5589_v59 = vmul.f32 0.35355338, %v583_v55 }
 0x263   : > { %v4524_v57 = vpop.f32.mrf.mxu1  ;;  %v4542_v58 = vpop.f32.mrf.mxu0 }
 0x264   : > { %v747_v60 = vsel %vm346_vm2, %v737_v56, -inf  ;;  %v756_v1 = vsel %vm346_vm2, %v5589_v59, -inf }
 0x265   : > { %v439_v61 = vpop.f32.mrf.mxu1  ;;  %v586_v62 = vpop.f32.mrf.mxu0  ;;  %748 = vmax.xlane.f32.xlu1 %v747_v60 }
 0x267   : > { %v4525_v63 = vpop.f32.mrf.mxu1  ;;  %v4543_v0 = vpop.f32.mrf.mxu0 }
 0x269   : > { %v534_v2 = vpop.f32.mrf.mxu1  ;;  %v681_v3 = vpop.f32.mrf.mxu0  ;;  %757 = vmax.xlane.f32.xlu1 %v756_v1 }
 0x26a   : > { %v739_v4 = vmul.f32 0.35355338, %v534_v2  ;;  %v5594_v22 = vmul.f32 0.35355338, %v681_v3 }
 0x26b   : > { %v4536_v23 = vpop.f32.mrf.mxu1  ;;  %v4554_v24 = vpop.f32.mrf.mxu0 }
 0x26c   : > { %v753_v25 = vsel %vm346_vm2, %v739_v4, -inf  ;;  %v762_v26 = vsel %vm346_vm2, %v5594_v22, -inf }
 0x26d   : > { %v537_v27 = vpop.f32.mrf.mxu1  ;;  %754 = vmax.xlane.f32.xlu0 %v753_v25  ;;  %v684_v28 = vpop.f32.mrf.mxu0  ;;  %763 = vmax.xlane.f32.xlu1 %v762_v26 }
 0x26f   : > { %v4537_v29 = vpop.f32.mrf.mxu1  ;;  %v4555_v30 = vpop.f32.mrf.mxu0 }
 0x271   : > { %v632_v31 = vpop.f32.mrf.mxu1 }
 0x272   : > { %v741_v32 = vmul.f32 0.35355338, %v632_v31 }
 0x273   : > { %v4548_v33 = vpop.f32.mrf.mxu1 }
 0x274   : > { %v759_v34 = vsel %vm346_vm2, %v741_v32, -inf }
 0x275   : > { %760 = vmax.xlane.f32.xlu0 %v759_v34  ;;  %v635_v35 = vpop.f32.mrf.mxu1 }
 0x277   : > { %v4549_v36 = vpop.f32.mrf.mxu1 }
 0x279   : > { %v730_v37 = vpop.f32.mrf.mxu1 }
 0x27a   : > { %v743_v38 = vmul.f32 0.35355338, %v730_v37 }
 0x27b   : > { %v4560_v39 = vpop.f32.mrf.mxu1 }
 0x27c   : > { %v765_v40 = vsel %vm346_vm2, %v743_v38, -inf }
 0x27d   : > { %766 = vmax.xlane.f32.xlu0 %v765_v40  ;;  %v733_v41 = vpop.f32.mrf.mxu1 }
 0x27e   : > { %985 = vrot.lane.b32.xlu1 %v5483_v11, %s5279_s20 }
 0x27f   : > { %v4561_v42 = vpop.f32.mrf.mxu1 }
 0x293   : > { %1033 = vrot.lane.b32.xlu0 %v5503_v16, %s5279_s20 }
 0x2e4   : > { %v752_v44 = vpop.xlane.xlu0 %751 }
 0x2e5   : > { %v770_v45 = vsub.f32 %v738_v43, %v752_v44 }
 0x2e7   : > { %v780_v47 = vmul.f32 1.442695, %v770_v45 }
 0x2e8   : > { %v746_v48 = vpop.xlane.xlu0 %745 }
 0x2e9   : > { %4993 = vpow2.f32 %v780_v47  ;;  %v768_v49 = vsub.f32 %v736_v46, %v746_v48  ;;  %v943_v48 = vsel %vm845_vm3, %v5605_v50, 0 }
 0x2eb   : > { %v776_v51 = vmul.f32 1.442695, %v768_v49 }
 0x2ed   : > { %4995 = vpow2.f32 %v776_v51 }
 0x2ee   : > { %v749_v52 = vpop.xlane.xlu1 %748 }
 0x2ef   : > { %v769_v53 = vsub.f32 %v737_v56, %v749_v52 }
 0x2f1   : > { %v778_v54 = vmul.f32 1.442695, %v769_v53 }
 0x2f2   : > { %v758_v24 = vpop.xlane.xlu1 %757 }
 0x2f3   : > { %4997 = vpow2.f32 %v778_v54  ;;  %v772_v25 = vsub.f32 %v5589_v59, %v758_v24 }
 0x2f5   : > { %v784_v27 = vmul.f32 1.442695, %v772_v25 }
 0x2f6   : > { %v5607_v55 = vpop.eup %4993  ;;  %v755_v57 = vpop.xlane.xlu0 %754 }
 0x2f7   : > { %v771_v58 = vsub.f32 %v739_v4, %v755_v57  ;;  %v798_v60 = vsel %vm346_vm2, %v5607_v55, 0.0  ;;  %v764_v26 = vpop.xlane.xlu1 %763 }
 0x2f8   : > { %799 = vadd.xlane.f32.xlu1 %v798_v60  ;;  %v774_v28 = vsub.f32 %v5594_v22, %v764_v26 }
 0x2f9   : > { %v782_v43 = vmul.f32 1.442695, %v771_v58 }
 0x2fa   : > { %v5611_v61 = vpop.eup %4995  ;;  %v788_v29 = vmul.f32 1.442695, %v774_v28 }
 0x2fb   : > { %4999 = vpow2.f32 %v782_v43  ;;  %v792_v46 = vsel %vm346_vm2, %v5611_v61, 0.0  ;;  %v986_v37 = vpop.permute.xlu1 %985 }
 0x2fc   : > { %793 = vadd.xlane.f32.xlu1 %v792_v46  ;;  %v991_v57 = vsel %vm845_vm3, %v986_v37, 0 }
 0x2fe   : > { %v761_v62 = vpop.xlane.xlu0 %760 }
 0x2ff   : > { %v773_v56 = vsub.f32 %v741_v32, %v761_v62 }
 0x300   : > { %v5615_v63 = vpop.eup %4997 }
 0x301   : > { %v786_v0 = vmul.f32 1.442695, %v773_v56  ;;  %v795_v1 = vsel %vm346_vm2, %v5615_v63, 0.0 }
 0x302   : > { %796 = vadd.xlane.f32.xlu0 %v795_v1 }
 0x303   : > { %5001 = vpow2.f32 %v786_v0 }
 0x304   : > { %5003 = vpow2.f32 %v784_v27 }
 0x305   : > { %5005 = vpow2.f32 %v788_v29 }
 0x306   : > { %v767_v30 = vpop.xlane.xlu0 %766 }
 0x307   : > { %v775_v32 = vsub.f32 %v743_v38, %v767_v30 }
 0x308   : > { %v5619_v2 = vpop.eup %4999 }
 0x309   : > { %v801_v3 = vsel %vm346_vm2, %v5619_v2, 0.0  ;;  %v790_v59 = vmul.f32 1.442695, %v775_v32 }
 0x30a   : > { %802 = vadd.xlane.f32.xlu0 %v801_v3  ;;  %v1034_v40 = vpop.permute.xlu0 %1033 }
 0x30b   : > { %5007 = vpow2.f32 %v790_v59  ;;  %v1039_v58 = vsel %vm845_vm3, %v1034_v40, 0 }
 0x30d   : > { %1081 = vrot.lane.b32.xlu1 %v5517_v20, %s5279_s20 }
 0x310   : > { %v5625_v4 = vpop.eup %5001 }
 0x311   : > { %v807_v23 = vsel %vm346_vm2, %v5625_v4, 0.0  ;;  %v5633_v31 = vpop.eup %5003 }
 0x312   : > { %808 = vadd.xlane.f32.xlu0 %v807_v23  ;;  %v804_v33 = vsel %vm346_vm2, %v5633_v31, 0.0  ;;  %v5637_v34 = vpop.eup %5005 }
 0x313   : > { %v810_v22 = vsel %vm346_vm2, %v5637_v34, 0.0 }
 0x318   : > { %v5641_v35 = vpop.eup %5007 }
 0x319   : > { %v813_v36 = vsel %vm346_vm2, %v5641_v35, 0.0 }
 0x328   : > { %1129 = vrot.lane.b32.xlu0 %v5509_v18, %s5279_s20 }
 0x331   : > { %805 = vadd.xlane.f32.xlu1 %v804_v33 }
 0x335   : > { %811 = vadd.xlane.f32.xlu1 %v810_v22 }
 0x346   : > { %1177 = vrot.lane.b32.xlu1 %v5521_v21, %s5279_s20 }
 0x347   : > { %814 = vadd.xlane.f32.xlu0 %v813_v36 }
 0x34a   : > { %1277 = vrot.lane.b32.xlu1 %v5491_v13, %s5280_s27 }
 0x34e   : > { %1275 = vrot.lane.b32.xlu1 %v5491_v13, %s5281_s28 }
 0x352   : > { %1377 = vrot.lane.b32.xlu1 %v5483_v11, %s5280_s27 }
 0x356   : > { %1375 = vrot.lane.b32.xlu1 %v5483_v11, %s5281_s28 }
 0x35a   : > { %1477 = vrot.lane.b32.xlu1 %v5517_v20, %s5280_s27 }
 0x35d   : > { %1227 = vrot.lane.b32.xlu0 %v5475_v9, %s5280_s27 }
 0x35e   : > { %1475 = vrot.lane.b32.xlu1 %v5517_v20, %s5281_s28 }
 0x361   : > { %1225 = vrot.lane.b32.xlu0 %v5475_v9, %s5281_s28 }
 0x362   : > { %1577 = vrot.lane.b32.xlu1 %v5521_v21, %s5280_s27 }
 0x365   : > { %1327 = vrot.lane.b32.xlu0 %v5469_v7, %s5280_s27 }
 0x366   : > { %1575 = vrot.lane.b32.xlu1 %v5521_v21, %s5281_s28 }
 0x369   : > { %1325 = vrot.lane.b32.xlu0 %v5469_v7, %s5281_s28 }
 0x36a   : > { %1729 = vrot.lane.b32.xlu1 %v5475_v9, %s5282_s25 }
 0x36d   : > { %1427 = vrot.lane.b32.xlu0 %v5503_v16, %s5280_s27 }
 0x371   : > { %1425 = vrot.lane.b32.xlu0 %v5503_v16, %s5281_s28 }
 0x375   : > { %1527 = vrot.lane.b32.xlu0 %v5509_v18, %s5280_s27 }
 0x379   : > { %1525 = vrot.lane.b32.xlu0 %v5509_v18, %s5281_s28 }
 0x381   : > { %v800_v38 = vpop.xlane.xlu1 %799 }
 0x385   : > { %v794_v39 = vpop.xlane.xlu1 %793 }
 0x386   : > { %5009 = vrcp.f32 %v794_v39 }
 0x387   : > { %5011 = vrcp.f32 %v800_v38 }
 0x389   : > { %v1082_v43 = vpop.permute.xlu1 %1081 }
 0x38a   : > { %v1087_v46 = vsel %vm845_vm3, %v1082_v43, 0 }
 0x38b   : > { %v797_v41 = vpop.xlane.xlu0 %796 }
 0x38c   : > { %5013 = vrcp.f32 %v797_v41 }
 0x393   : > { %v5010_v9 = vpop.eup %5009  ;;  %v803_v42 = vpop.xlane.xlu0 %802 }
 0x394   : > { %5015 = vrcp.f32 %v803_v42  ;;  %v824_v44 = vmul.f32 %v5010_v9, %v5611_v61  ;;  %v5012_v47 = vpop.eup %5011 }
 0x395   : > { %v826_v52 = vmul.f32 %v5012_v47, %v5607_v55 }
 0x396   : > { %v832_v45 = vpack.c.bf16 %v824_v44, %v824_v44 }
 0x397   : > { %v834_v50 = vpack.c.bf16 %v826_v52, %v826_v52 }
 0x398   : > { %4565 = vmatmul.mubr.msk.bf16.vlgmr.msra.gmra.mxu0 %vm346_vm2, %v832_v45 }
 0x399   : > { %v5014_v49 = vpop.eup %5013  ;;  %4575 = vmatpush3.bf16.msra.mxu0 %v943_v48  ;;  %4576 = vmatprep.mubr.msk.bf16.mxu0 %vm5277_vm1, %v5276_v5 }
 0x39a   : > { %v825_v51 = vmul.f32 %v5014_v49, %v5615_v63  ;;  %4586 = vmatprep.subr.bf16.mxu0 %v5276_v5 }
 0x39b   : > { %v809_v53 = vpop.xlane.xlu0 %808 }
 0x39c   : > { %5017 = vrcp.f32 %v809_v53  ;;  %v833_v54 = vpack.c.bf16 %v825_v51, %v825_v51 }
 0x39e   : > { %4571 = vmatmul.mubr.msk.bf16.vlgmr.msra.gmra.mxu1 %vm346_vm2, %v833_v54 }
 0x39f   : > { %4581 = vmatpush3.bf16.msra.mxu1 %v991_v57  ;;  %4582 = vmatprep.mubr.msk.bf16.mxu1 %vm5277_vm1, %v5276_v5  ;;  %v1130_v25 = vpop.permute.xlu0 %1129 }
 0x3a0   : > { %4577 = vmatmul.mubr.msk.bf16.vlgmr.msra.gmra.mxu0 %vm346_vm2, %v834_v50  ;;  %4592 = vmatprep.subr.bf16.mxu1 %v5276_v5  ;;  %v1135_v29 = vsel %vm845_vm3, %v1130_v25, 0 }
 0x3a1   : > { %v5016_v60 = vpop.eup %5015  ;;  %4587 = vmatpush3.bf16.msra.mxu0 %v1039_v58  ;;  %4588 = vmatprep.mubr.msk.bf16.mxu0 %vm5277_vm1, %v5276_v5 }
 0x3a2   : > { %v827_v55 = vmul.f32 %v5016_v60, %v5619_v2  ;;  %4598 = vmatprep.subr.bf16.mxu0 %v5276_v5 }
 0x3a4   : > { %v835_v61 = vpack.c.bf16 %v827_v55, %v827_v55 }
 0x3a6   : > { %4583 = vmatmul.mubr.msk.bf16.vlgmr.msra.gmra.mxu1 %vm346_vm2, %v835_v61 }
 0x3a7   : > { %4593 = vmatpush3.bf16.msra.mxu1 %v1087_v46  ;;  %4594 = vmatprep.mubr.msk.bf16.mxu1 %vm5277_vm1, %v5276_v5 }
 0x3a8   : > { %4604 = vmatprep.subr.bf16.mxu1 %v5276_v5 }
 0x3a9   : > { %v5018_v62 = vpop.eup %5017 }
 0x3aa   : > { %v829_v56 = vmul.f32 %v5018_v62, %v5625_v4 }
 0x3ac   : > { %v837_v63 = vpack.c.bf16 %v829_v56, %v829_v56 }
 0x3ae   : > { %4595 = vmatmul.mubr.msk.bf16.vlgmr.msra.gmra.mxu1 %vm346_vm2, %v837_v63 }
 0x3af   : > { %4606 = vmatprep.mubr.msk.bf16.mxu1 %vm5277_vm1, %v5276_v5 }
 0x3ba   : > { %v806_v0 = vpop.xlane.xlu1 %805 }
 0x3bb   : > { %5019 = vrcp.f32 %v806_v0 }
 0x3be   : > { %v812_v1 = vpop.xlane.xlu1 %811 }
 0x3bf   : > { %5021 = vrcp.f32 %v812_v1 }
 0x3c2   : > { %v1178_v2 = vpop.permute.xlu1 %1177 }
 0x3c3   : > { %v1183_v3 = vsel %vm845_vm3, %v1178_v2, 0 }
 0x3c4   : > { %4605 = vmatpush3.bf16.msra.mxu1 %v1183_v3 }
 0x3c5   : > { %4616 = vmatprep.subr.bf16.mxu1 %v5276_v5 }
 0x3c6   : > { %v1278_v23 = vpop.permute.xlu1 %1277 }
 0x3c7   : > { %v1283_v45 = vsel %vm346_vm2, %v1278_v23, 0 }
 0x3c8   : > { %v5020_v24 = vpop.eup %5019 }
 0x3c9   : > { %v828_v4 = vmul.f32 %v5020_v24, %v5633_v31 }
 0x3ca   : > { %v1276_v26 = vpop.permute.xlu1 %1275 }
 0x3cb   : > { %v836_v27 = vpack.c.bf16 %v828_v4, %v828_v4 }
 0x3cc   : > { %v5022_v28 = vpop.eup %5021 }
 0x3cd   : > { %4589 = vmatmul.mubr.msk.bf16.vlgmr.msra.gmra.mxu0 %vm346_vm2, %v836_v27  ;;  %v830_v32 = vmul.f32 %v5022_v28, %v5637_v34 }
 0x3ce   : > { %4599 = vmatpush3.bf16.msra.mxu0 %v1135_v29  ;;  %v1378_v30 = vpop.permute.xlu1 %1377  ;;  %4600 = vmatprep.mubr.msk.bf16.mxu0 %vm5277_vm1, %v5276_v5 }
 0x3cf   : > { %4610 = vmatprep.subr.bf16.mxu0 %v5276_v5  ;;  %v838_v31 = vpack.c.bf16 %v830_v32, %v830_v32  ;;  %v1383_v51 = vsel %vm346_vm2, %v1378_v30, 0 }
 0x3d0   : > { %v815_v33 = vpop.xlane.xlu0 %814 }
 0x3d1   : > { %5023 = vrcp.f32 %v815_v33 }
 0x3d2   : > { %v1376_v59 = vpop.permute.xlu1 %1375 }
 0x3d4   : > { %v1228_v22 = vpop.permute.xlu0 %1227 }
 0x3d5   : > { %v1233_v36 = vsel %vm346_vm2, %v1228_v22, 0  ;;  %4601 = vmatmul.mubr.msk.bf16.vlgmr.msra.gmra.mxu0 %vm346_vm2, %v838_v31 }
 0x3d6   : > { %4611 = vmatpush3.bf16.xpose.msra.mxu0 %v1233_v36  ;;  %4612 = vmatprep.mubr.msk.bf16.mxu0 %vm5277_vm1, %v5276_v5  ;;  %v1478_v38 = vpop.permute.xlu1 %1477 }
 0x3d7   : > { %4622 = vmatprep.subr.bf16.mxu0 %v5276_v5  ;;  %v1483_v50 = vsel %vm346_vm2, %v1478_v38, 0 }
 0x3d8   : > { %v1226_v37 = vpop.permute.xlu0 %1225 }
 0x3da   : > { %v1476_v9 = vpop.permute.xlu1 %1475 }
 0x3dc   : > { %v1328_v34 = vpop.permute.xlu0 %1327 }
 0x3dd   : > { %v1333_v39 = vsel %vm346_vm2, %v1328_v34, 0  ;;  %4613 = vmatmul.mubr.msk.bf16.vlgmr.msra.gmra.mxu0 %vm346_vm2, %v1226_v37 }
 0x3de   : > { %v5024_v40 = vpop.eup %5023  ;;  %4623 = vmatpush3.bf16.xpose.msra.mxu0 %v1333_v39  ;;  %4624 = vmatprep.mubr.msk.bf16.mxu0 %vm5277_vm1, %v5276_v5 }
 0x3df   : > { %v831_v41 = vmul.f32 %v5024_v40, %v5641_v35  ;;  %4634 = vmatprep.subr.bf16.mxu0 %v5276_v5  ;;  %v1578_v35 = vpop.permute.xlu1 %1577 }
 0x3e0   : > { %v1326_v42 = vpop.permute.xlu0 %1325  ;;  %v1583_v55 = vsel %vm346_vm2, %v1578_v35, 0 }
 0x3e1   : > { %v839_v44 = vpack.c.bf16 %v831_v41, %v831_v41 }
 0x3e3   : > { %4607 = vmatmul.mubr.msk.bf16.vlgmr.msra.gmra.mxu1 %vm346_vm2, %v839_v44  ;;  %v1576_v52 = vpop.permute.xlu1 %1575 }
 0x3e4   : > { %4617 = vmatpush3.bf16.xpose.msra.mxu1 %v1283_v45  ;;  %v1428_v47 = vpop.permute.xlu0 %1427  ;;  %4618 = vmatprep.mubr.msk.bf16.mxu1 %vm5277_vm1, %v5276_v5 }
 0x3e5   : > { %v1433_v48 = vsel %vm346_vm2, %v1428_v47, 0  ;;  %4625 = vmatmul.mubr.msk.bf16.vlgmr.msra.gmra.mxu0 %vm346_vm2, %v1326_v42  ;;  %4628 = vmatprep.subr.bf16.mxu1 %v5276_v5 }
 0x3e6   : > { %4635 = vmatpush3.bf16.xpose.msra.mxu0 %v1433_v48  ;;  %4636 = vmatprep.mubr.msk.bf16.mxu0 %vm5277_vm1, %v5276_v5 }
 0x3e7   : > { %4646 = vmatprep.subr.bf16.mxu0 %v5276_v5  ;;  %v1730_v57 = vpop.permute.xlu1 %1729 }
 0x3e8   : > { %v1426_v49 = vpop.permute.xlu0 %1425  ;;  %v1735_v60 = vsel %vm845_vm3, %v1730_v57, 0 }
 0x3eb   : > { %4619 = vmatmul.mubr.msk.bf16.vlgmr.msra.gmra.mxu1 %vm346_vm2, %v1276_v26 }
 0x3ec   : > { %4629 = vmatpush3.bf16.xpose.msra.mxu1 %v1383_v51  ;;  %v1528_v53 = vpop.permute.xlu0 %1527  ;;  %4630 = vmatprep.mubr.msk.bf16.mxu1 %vm5277_vm1, %v5276_v5 }
 0x3ed   : > { %v1533_v54 = vsel %vm346_vm2, %v1528_v53, 0  ;;  %4637 = vmatmul.mubr.msk.bf16.vlgmr.msra.gmra.mxu0 %vm346_vm2, %v1426_v49  ;;  %4640 = vmatprep.subr.bf16.mxu1 %v5276_v5 }
 0x3ee   : > { %4647 = vmatpush3.bf16.xpose.msra.mxu0 %v1533_v54  ;;  %4648 = vmatprep.mubr.msk.bf16.mxu0 %vm5277_vm1, %v5276_v5 }
 0x3ef   : > { %4658 = vmatprep.subr.bf16.mxu0 %v5276_v5 }
 0x3f0   : > { %v1526_v58 = vpop.permute.xlu0 %1525 }
 0x3f3   : > { %4631 = vmatmul.mubr.msk.bf16.vlgmr.msra.gmra.mxu1 %vm346_vm2, %v1376_v59 }
 0x3f4   : > { %4641 = vmatpush3.bf16.xpose.msra.mxu1 %v1483_v50  ;;  %4642 = vmatprep.mubr.msk.bf16.mxu1 %vm5277_vm1, %v5276_v5 }
 0x3f5   : > { %4649 = vmatmul.mubr.msk.bf16.vlgmr.msra.gmra.mxu0 %vm346_vm2, %v1526_v58  ;;  %4652 = vmatprep.subr.bf16.mxu1 %v5276_v5 }
 0x3f6   : > { %4659 = vmatpush3.bf16.msra.mxu0 %v1735_v60  ;;  %4660 = vmatprep.mubr.msk.bf16.mxu0 %vm5277_vm1, %v5276_v5 }
 0x3f7   : > { %4670 = vmatprep.subr.bf16.mxu0 %v5276_v5 }
 0x3fb   : > { %4643 = vmatmul.mubr.msk.bf16.vlgmr.msra.gmra.mxu1 %vm346_vm2, %v1476_v9 }
 0x3fc   : > { %4653 = vmatpush3.bf16.xpose.msra.mxu1 %v1583_v55  ;;  %4654 = vmatprep.mubr.msk.bf16.mxu1 %vm5277_vm1, %v5276_v5 }
 0x3fd   : > { %4664 = vmatprep.subr.bf16.mxu1 %v5276_v5 }
 0x403   : > { %4655 = vmatmul.mubr.msk.bf16.vlgmr.msra.gmra.mxu1 %vm346_vm2, %v1576_v52 }
 0x404   : > { %4666 = vmatprep.mubr.msk.bf16.mxu1 %vm5277_vm1, %v5276_v5 }
 0x458   : > { %v5768_v43 = vpop.f32.mrf.mxu0 }
 0x45a   : > { %v4566_v61 = vpop.f32.mrf.mxu0 }
 0x45c   : > { %v886_v46 = vpop.f32.mrf.mxu0 }
 0x45e   : > { %v4567_v62 = vpop.f32.mrf.mxu0  ;;  %v5770_v56 = vpop.f32.mrf.mxu1 }
 0x460   : > { %v4572_v63 = vpop.f32.mrf.mxu1  ;;  %v5772_v0 = vpop.f32.mrf.mxu0 }
 0x462   : > { %v934_v1 = vpop.f32.mrf.mxu1  ;;  %v4578_v2 = vpop.f32.mrf.mxu0 }
 0x464   : > { %v4573_v3 = vpop.f32.mrf.mxu1  ;;  %v982_v23 = vpop.f32.mrf.mxu0 }
 0x466   : > { %v4579_v24 = vpop.f32.mrf.mxu0  ;;  %v5774_v4 = vpop.f32.mrf.mxu1 }
 0x468   : > { %v4584_v25 = vpop.f32.mrf.mxu1 }
 0x46a   : > { %v1030_v26 = vpop.f32.mrf.mxu1 }
 0x46c   : > { %v4585_v27 = vpop.f32.mrf.mxu1 }
 0x46e   : > { %v5776_v28 = vpop.f32.mrf.mxu1 }
 0x470   : > { %v4596_v29 = vpop.f32.mrf.mxu1 }
 0x472   : > { %v1126_v30 = vpop.f32.mrf.mxu1 }
 0x474   : > { %v4597_v32 = vpop.f32.mrf.mxu1 }
 0x48d   : > { %v5778_v33 = vpop.f32.mrf.mxu0 }
 0x48f   : > { %v4590_v31 = vpop.f32.mrf.mxu0 }
 0x491   : > { %v1078_v59 = vpop.f32.mrf.mxu0 }
 0x493   : > { %v4591_v22 = vpop.f32.mrf.mxu0 }
 0x495   : > { %v5780_v36 = vpop.f32.mrf.mxu0 }
 0x497   : > { %v4602_v37 = vpop.f32.mrf.mxu0 }
 0x499   : > { %v1174_v38 = vpop.f32.mrf.mxu0 }
 0x49b   : > { %v4603_v34 = vpop.f32.mrf.mxu0 }
 0x49d   : > { %v1269_v39 = vpop.f32.mrf.mxu0 }
 0x49e   : > { %v5782_v40 = vmul.f32 0.35355338, %v1269_v39 }
 0x49f   : > { %v4614_v41 = vpop.f32.mrf.mxu0 }
 0x4a0   : > { %v1633_v9 = vsel %vm346_vm2, %v5782_v40, -inf }
 0x4a1   : > { %1634 = vmax.xlane.f32.xlu0 %v1633_v9  ;;  %v1272_v42 = vpop.f32.mrf.mxu0 }
 0x4a3   : > { %v5786_v44 = vpop.f32.mrf.mxu1  ;;  %v4615_v45 = vpop.f32.mrf.mxu0 }
 0x4a5   : > { %v4608_v47 = vpop.f32.mrf.mxu1  ;;  %v1369_v48 = vpop.f32.mrf.mxu0 }
 0x4a6   : > { %v1627_v35 = vmul.f32 0.35355338, %v1369_v48 }
 0x4a7   : > { %v1222_v49 = vpop.f32.mrf.mxu1  ;;  %v4626_v51 = vpop.f32.mrf.mxu0 }
 0x4a8   : > { %v1639_v52 = vsel %vm346_vm2, %v1627_v35, -inf }
 0x4a9   : > { %1640 = vmax.xlane.f32.xlu0 %v1639_v52  ;;  %v4609_v53 = vpop.f32.mrf.mxu1  ;;  %v1372_v54 = vpop.f32.mrf.mxu0 }
 0x4ab   : > { %v1319_v57 = vpop.f32.mrf.mxu1  ;;  %v4627_v50 = vpop.f32.mrf.mxu0 }
 0x4ac   : > { %v1626_v58 = vmul.f32 0.35355338, %v1319_v57 }
 0x4ad   : > { %v4620_v60 = vpop.f32.mrf.mxu1  ;;  %v1469_v55 = vpop.f32.mrf.mxu0 }
 0x4ae   : > { %v5789_v61 = vmul.f32 0.35355338, %v1469_v55  ;;  %v1636_v46 = vsel %vm346_vm2, %v1626_v58, -inf }
 0x4af   : > { %v4638_v62 = vpop.f32.mrf.mxu0  ;;  %1637 = vmax.xlane.f32.xlu1 %v1636_v46  ;;  %v1322_v63 = vpop.f32.mrf.mxu1 }
 0x4b0   : > { %v1645_v3 = vsel %vm346_vm2, %v5789_v61, -inf }
 0x4b1   : > { %v4621_v1 = vpop.f32.mrf.mxu1  ;;  %v1472_v2 = vpop.f32.mrf.mxu0 }
 0x4b3   : > { %v4639_v23 = vpop.f32.mrf.mxu0  ;;  %1646 = vmax.xlane.f32.xlu1 %v1645_v3  ;;  %v1419_v24 = vpop.f32.mrf.mxu1 }
 0x4b4   : > { %v1628_v25 = vmul.f32 0.35355338, %v1419_v24 }
 0x4b5   : > { %v4632_v26 = vpop.f32.mrf.mxu1  ;;  %v1569_v27 = vpop.f32.mrf.mxu0 }
 0x4b6   : > { %v5794_v29 = vmul.f32 0.35355338, %v1569_v27  ;;  %v1642_v30 = vsel %vm346_vm2, %v1628_v25, -inf }
 0x4b7   : > { %v4650_v32 = vpop.f32.mrf.mxu0  ;;  %1643 = vmax.xlane.f32.xlu0 %v1642_v30  ;;  %v1422_v31 = vpop.f32.mrf.mxu1 }
 0x4b8   : > { %v1651_v59 = vsel %vm346_vm2, %v5794_v29, -inf }
 0x4b9   : > { %v1572_v22 = vpop.f32.mrf.mxu0  ;;  %1652 = vmax.xlane.f32.xlu1 %v1651_v59  ;;  %v4633_v37 = vpop.f32.mrf.mxu1 }
 0x4bb   : > { %v1519_v38 = vpop.f32.mrf.mxu1  ;;  %v4651_v34 = vpop.f32.mrf.mxu0 }
 0x4bc   : > { %v1630_v39 = vmul.f32 0.35355338, %v1519_v38 }
 0x4bd   : > { %v4644_v41 = vpop.f32.mrf.mxu1 }
 0x4be   : > { %v1648_v9 = vsel %vm346_vm2, %v1630_v39, -inf }
 0x4bf   : > { %1649 = vmax.xlane.f32.xlu0 %v1648_v9  ;;  %v1522_v42 = vpop.f32.mrf.mxu1 }
 0x4c1   : > { %v4645_v45 = vpop.f32.mrf.mxu1 }
 0x4c3   : > { %v1619_v47 = vpop.f32.mrf.mxu1 }
 0x4c4   : > { %v1632_v48 = vmul.f32 0.35355338, %v1619_v47 }
 0x4c5   : > { %v4656_v49 = vpop.f32.mrf.mxu1 }
 0x4c6   : > { %v1654_v51 = vsel %vm346_vm2, %v1632_v48, -inf }
 0x4c7   : > { %1655 = vmax.xlane.f32.xlu0 %v1654_v51  ;;  %v1622_v52 = vpop.f32.mrf.mxu1 }
 0x4c9   : > { %v4657_v53 = vpop.f32.mrf.mxu1 }
 0x4ca   : > { %1825 = vrot.lane.b32.xlu1 %v5469_v7, %s5282_s25 }
 0x4dd   : > { %1777 = vrot.lane.b32.xlu0 %v5491_v13, %s5282_s25 }
 0x52a   : > { %v1635_v54 = vpop.xlane.xlu0 %1634 }
 0x52b   : > { %v1657_v57 = vsub.f32 %v5782_v40, %v1635_v54 }
 0x52d   : > { %v1665_v50 = vmul.f32 1.442695, %v1657_v57 }
 0x52f   : > { %5025 = vpow2.f32 %v1665_v50 }
 0x532   : > { %v1641_v60 = vpop.xlane.xlu0 %1640 }
 0x533   : > { %v1659_v55 = vsub.f32 %v1627_v35, %v1641_v60 }
 0x535   : > { %v1669_v46 = vmul.f32 1.442695, %v1659_v55 }
 0x537   : > { %5027 = vpow2.f32 %v1669_v46 }
 0x538   : > { %v1638_v62 = vpop.xlane.xlu1 %1637 }
 0x539   : > { %v1658_v63 = vsub.f32 %v1626_v58, %v1638_v62 }
 0x53b   : > { %v1667_v1 = vmul.f32 1.442695, %v1658_v63 }
 0x53c   : > { %v5806_v2 = vpop.eup %5025  ;;  %v1647_v59 = vpop.xlane.xlu1 %1646 }
 0x53d   : > { %5029 = vpow2.f32 %v1667_v1  ;;  %v1681_v7 = vsel %vm346_vm2, %v5806_v2, 0.0  ;;  %v1661_v22 = vsub.f32 %v5789_v61, %v1647_v59 }
 0x53e   : > { %1682 = vadd.xlane.f32.xlu1 %v1681_v7 }
 0x53f   : > { %v1673_v38 = vmul.f32 1.442695, %v1661_v22 }
 0x540   : > { %v1644_v13 = vpop.xlane.xlu0 %1643 }
 0x541   : > { %v1660_v3 = vsub.f32 %v1628_v25, %v1644_v13 }
 0x542   : > { %v1653_v37 = vpop.xlane.xlu1 %1652 }
 0x543   : > { %v1671_v23 = vmul.f32 1.442695, %v1660_v3  ;;  %v1663_v34 = vsub.f32 %v5794_v29, %v1653_v37 }
 0x544   : > { %v5810_v40 = vpop.eup %5027 }
 0x545   : > { %5031 = vpow2.f32 %v1671_v23  ;;  %v1687_v35 = vsel %vm346_vm2, %v5810_v40, 0.0  ;;  %v1677_v41 = vmul.f32 1.442695, %v1663_v34 }
 0x546   : > { %1688 = vadd.xlane.f32.xlu1 %v1687_v35  ;;  %5033 = vpow2.f32 %v1673_v38  ;;  %v1826_v51 = vpop.permute.xlu1 %1825 }
 0x547   : > { %5035 = vpow2.f32 %v1677_v41  ;;  %v1831_v60 = vsel %vm845_vm3, %v1826_v51, 0 }
 0x548   : > { %v1650_v26 = vpop.xlane.xlu0 %1649 }
 0x549   : > { %v1662_v9 = vsub.f32 %v1630_v39, %v1650_v26 }
 0x54a   : > { %v5814_v24 = vpop.eup %5029 }
 0x54b   : > { %v1684_v58 = vsel %vm346_vm2, %v5814_v24, 0.0 }
 0x54c   : > { %1685 = vadd.xlane.f32.xlu0 %v1684_v58 }
 0x550   : > { %v1656_v27 = vpop.xlane.xlu0 %1655 }
 0x551   : > { %v1664_v42 = vsub.f32 %v1632_v48, %v1656_v27 }
 0x552   : > { %v5818_v30 = vpop.eup %5031 }
 0x553   : > { %v1690_v25 = vsel %vm346_vm2, %v5818_v30, 0.0  ;;  %v1679_v45 = vmul.f32 1.442695, %v1664_v42  ;;  %v5832_v47 = vpop.eup %5033 }
 0x554   : > { %v1778_v32 = vpop.permute.xlu0 %1777  ;;  %1691 = vadd.xlane.f32.xlu0 %v1690_v25  ;;  %v5836_v61 = vpop.eup %5035 }
 0x555   : > { %v1783_v31 = vsel %vm845_vm3, %v1778_v32, 0 }
 0x556   : > { %4665 = vmatpush3.bf16.msra.mxu1 %v1783_v31 }
 0x557   : > { %1921 = vrot.lane.b32.xlu1 %v5503_v16, %s5282_s25  ;;  %4676 = vmatprep.subr.bf16.mxu1 %v5276_v5  ;;  %v1675_v16 = vmul.f32 1.442695, %v1662_v9 }
 0x559   : > { %5037 = vpow2.f32 %v1675_v16 }
 0x55a   : > { %5039 = vpow2.f32 %v1679_v45 }
 0x55b   : > { %1969 = vrot.lane.b32.xlu1 %v5517_v20, %s5282_s25  ;;  %v1693_v20 = vsel %vm346_vm2, %v5832_v47, 0.0 }
 0x566   : > { %v5840_v29 = vpop.eup %5037 }
 0x567   : > { %v1696_v39 = vsel %vm346_vm2, %v5840_v29, 0.0  ;;  %v5844_v48 = vpop.eup %5039 }
 0x568   : > { %v1702_v49 = vsel %vm346_vm2, %v5844_v48, 0.0 }
 0x56a   : > { %1873 = vrot.lane.b32.xlu0 %v5483_v11, %s5282_s25  ;;  %v1699_v11 = vsel %vm346_vm2, %v5836_v61, 0.0 }
 0x57f   : > { %1694 = vadd.xlane.f32.xlu1 %v1693_v20 }
 0x583   : > { %1700 = vadd.xlane.f32.xlu1 %v1699_v11 }
 0x589   : > { %1697 = vadd.xlane.f32.xlu0 %v1696_v39 }
 0x58d   : > { %1703 = vadd.xlane.f32.xlu0 %v1702_v49 }
 0x594   : > { %2065 = vrot.lane.b32.xlu1 %v5521_v21, %s5282_s25 }
 0x598   : > { %2163 = vrot.lane.b32.xlu1 %v5487_v12, %s5283_s29 }
 0x5a3   : > { %2017 = vrot.lane.b32.xlu0 %v5509_v18, %s5282_s25 }
 0x5a7   : > { %2161 = vrot.lane.b32.xlu0 %v5471_v8, %s5283_s29 }
 0x5c7   : > { %v1683_v52 = vpop.xlane.xlu1 %1682 }
 0x5c8   : > { %5041 = vrcp.f32 %v1683_v52 }
 0x5cf   : > { %v1689_v53 = vpop.xlane.xlu1 %1688 }
 0x5d0   : > { %5043 = vrcp.f32 %v1689_v53 }
 0x5d3   : > { %v1922_v55 = vpop.permute.xlu1 %1921 }
 0x5d4   : > { %v1927_v62 = vsel %vm845_vm3, %v1922_v55, 0 }
 0x5d5   : > { %v5042_v54 = vpop.eup %5041  ;;  %v1686_v57 = vpop.xlane.xlu0 %1685 }
 0x5d6   : > { %5045 = vrcp.f32 %v1686_v57  ;;  %v1713_v21 = vmul.f32 %v5042_v54, %v5806_v2  ;;  %v4992_v57 = vld [vmem:[#allocation7] sm:$0xff]  }
 0x5d8   : > { %v1721_v50 = vpack.c.bf16 %v1713_v21, %v1713_v21 }
 0x5da   : > { %4661 = vmatmul.mubr.msk.bf16.vlgmr.msra.gmra.mxu0 %vm346_vm2, %v1721_v50 }
 0x5db   : > { %4671 = vmatpush3.bf16.msra.mxu0 %v1831_v60  ;;  %4672 = vmatprep.mubr.msk.bf16.mxu0 %vm5277_vm1, %v5276_v5 }
 0x5dc   : > { %4682 = vmatprep.subr.bf16.mxu0 %v5276_v5 }
 0x5dd   : > { %v5044_v8 = vpop.eup %5043  ;;  %v1692_v12 = vpop.xlane.xlu0 %1691 }
 0x5de   : > { %5047 = vrcp.f32 %v1692_v12  ;;  %v1715_v18 = vmul.f32 %v5044_v8, %v5810_v40  ;;  %v1970_v40 = vpop.permute.xlu1 %1969 }
 0x5e0   : > { %v1723_v46 = vpack.c.bf16 %v1715_v18, %v1715_v18 }
 0x5e1   : > { %v1874_v2 = vpop.permute.xlu0 %1873 }
 0x5e2   : > { %4673 = vmatmul.mubr.msk.bf16.vlgmr.msra.gmra.mxu0 %vm346_vm2, %v1723_v46  ;;  %v1879_v13 = vsel %vm845_vm3, %v1874_v2, 0 }
 0x5e3   : > { %v5046_v63 = vpop.eup %5045  ;;  %4683 = vmatpush3.bf16.msra.mxu0 %v1927_v62  ;;  %4684 = vmatprep.mubr.msk.bf16.mxu0 %vm5277_vm1, %v5276_v5 }
 0x5e4   : > { %v1714_v1 = vmul.f32 %v5046_v63, %v5814_v24  ;;  %4694 = vmatprep.subr.bf16.mxu0 %v5276_v5  ;;  %v1975_v24 = vsel %vm845_vm3, %v1970_v40, 0 }
 0x5e6   : > { %v1722_v7 = vpack.c.bf16 %v1714_v1, %v1714_v1 }
 0x5e8   : > { %4667 = vmatmul.mubr.msk.bf16.vlgmr.msra.gmra.mxu1 %vm346_vm2, %v1722_v7 }
 0x5e9   : > { %4677 = vmatpush3.bf16.msra.mxu1 %v1879_v13  ;;  %4678 = vmatprep.mubr.msk.bf16.mxu1 %vm5277_vm1, %v5276_v5 }
 0x5ea   : > { %4688 = vmatprep.subr.bf16.mxu1 %v5276_v5 }
 0x5eb   : > { %v5048_v3 = vpop.eup %5047 }
 0x5ec   : > { %v1716_v23 = vmul.f32 %v5048_v3, %v5818_v30 }
 0x5ee   : > { %v1724_v35 = vpack.c.bf16 %v1716_v23, %v1716_v23 }
 0x5f0   : > { %4679 = vmatmul.mubr.msk.bf16.vlgmr.msra.gmra.mxu1 %vm346_vm2, %v1724_v35 }
 0x5f1   : > { %4689 = vmatpush3.bf16.msra.mxu1 %v1975_v24  ;;  %4690 = vmatprep.mubr.msk.bf16.mxu1 %vm5277_vm1, %v5276_v5 }
 0x5f2   : > { %4700 = vmatprep.subr.bf16.mxu1 %v5276_v5 }
 0x608   : > { %v1695_v58 = vpop.xlane.xlu1 %1694 }
 0x609   : > { %5049 = vrcp.f32 %v1695_v58 }
 0x60c   : > { %v1701_v26 = vpop.xlane.xlu1 %1700 }
 0x60d   : > { %5051 = vrcp.f32 %v1701_v26 }
 0x610   : > { %v2066_v16 = vpop.permute.xlu1 %2065 }
 0x612   : > { %v1698_v27 = vpop.xlane.xlu0 %1697 }
 0x613   : > { %5053 = vrcp.f32 %v1698_v27 }
 0x614   : > { %v2164_v27 = vpop.permute.xlu1 %2163 }
 0x616   : > { %v5050_v25 = vpop.eup %5049  ;;  %v1704_v30 = vpop.xlane.xlu0 %1703 }
 0x617   : > { %5055 = vrcp.f32 %v1704_v30  ;;  %v1717_v32 = vmul.f32 %v5050_v25, %v5832_v47  ;;  %v2071_v47 = vsel %vm845_vm3, %v2066_v16, 0 }
 0x619   : > { %v1725_v31 = vpack.c.bf16 %v1717_v32, %v1717_v32 }
 0x61a   : > { %v5052_v59 = vpop.eup %5051  ;;  %v2018_v22 = vpop.permute.xlu0 %2017 }
 0x61b   : > { %v2023_v37 = vsel %vm845_vm3, %v2018_v22, 0  ;;  %4685 = vmatmul.mubr.msk.bf16.vlgmr.msra.gmra.mxu0 %vm346_vm2, %v1725_v31  ;;  %v1719_v38 = vmul.f32 %v5052_v59, %v5836_v61 }
 0x61c   : > { %4695 = vmatpush3.bf16.msra.mxu0 %v2023_v37  ;;  %4696 = vmatprep.mubr.msk.bf16.mxu0 %vm5277_vm1, %v5276_v5 }
 0x61d   : > { %v1727_v41 = vpack.c.bf16 %v1719_v38, %v1719_v38  ;;  %4706 = vmatprep.subr.bf16.mxu0 %v4992_v57 }
 0x61e   : > { %v2162_v58 = vpop.permute.xlu0 %2161 }
 0x620   : > { %v5054_v34 = vpop.eup %5053 }
 0x621   : > { %v1718_v9 = vmul.f32 %v5054_v34, %v5840_v29 }
 0x623   : > { %4697 = vmatmul.mubr.msk.bf16.vlgmr.msra.gmra.mxu0 %vm346_vm2, %v1727_v41  ;;  %v1726_v42 = vpack.c.bf16 %v1718_v9, %v1718_v9 }
 0x624   : > { %v5056_v45 = vpop.eup %5055  ;;  %4707 = vmatpush3.bf16.msra.mxu0 %v4992_v57 }
 0x625   : > { %4691 = vmatmul.mubr.msk.bf16.vlgmr.msra.gmra.mxu1 %vm346_vm2, %v1726_v42  ;;  %v1720_v20 = vmul.f32 %v5056_v45, %v5844_v48  ;;  %4728 = vmatprep.subr.bf16.mxu0 %v5276_v5 }
 0x626   : > { %4701 = vmatpush3.bf16.msra.mxu1 %v2071_v47  ;;  %4702 = vmatprep.mubr.msk.bf16.mxu1 %vm5277_vm1, %v5276_v5 }
 0x627   : > { %4716 = vmatprep.subr.bf16.mxu1 %v5276_v5  ;;  %v1728_v61 = vpack.c.bf16 %v1720_v20, %v1720_v20 }
 0x62d   : > { %4703 = vmatmul.mubr.msk.bf16.vlgmr.msra.gmra.mxu1 %vm346_vm2, %v1728_v61 }
 0x62e   : > { %4718 = vmatprep.mubr.msk.bf16.mxu1 %vm5277_vm1, %v5276_v5 }
 0x69a   : > { %v1771_v11 = vpop.f32.mrf.mxu0 }
 0x69b   : > { %2121 = vrot.lane.b32.xlu0 %v1771_v11, %s5284_s30 }
 0x69c   : > { %v4662_v29 = vpop.f32.mrf.mxu0 }
 0x69e   : > { %v1774_v39 = vpop.f32.mrf.mxu0 }
 0x6a0   : > { %v4663_v49 = vpop.f32.mrf.mxu0 }
 0x6a2   : > { %v1867_v51 = vpop.f32.mrf.mxu0 }
 0x6a3   : > { %2125 = vrot.lane.b32.xlu0 %v1867_v51, %s5284_s30 }
 0x6a4   : > { %v4674_v52 = vpop.f32.mrf.mxu0 }
 0x6a6   : > { %v1870_v48 = vpop.f32.mrf.mxu0 }
 0x6a7   : > { %2165 = vrot.lane.b32.xlu0 %v5465_v6, %s5283_s29 }
 0x6a8   : > { %v1819_v53 = vpop.f32.mrf.mxu1  ;;  %v4675_v54 = vpop.f32.mrf.mxu0 }
 0x6a9   : > { %2123 = vrot.lane.b32.xlu1 %v1819_v53, %s5284_s30 }
 0x6aa   : > { %v4668_v21 = vpop.f32.mrf.mxu1 }
 0x6ab   : > { %2169 = vrot.lane.b32.xlu0 %v5499_v15, %s5283_s29 }
 0x6ac   : > { %v1822_v50 = vpop.f32.mrf.mxu1 }
 0x6ae   : > { %v4669_v60 = vpop.f32.mrf.mxu1 }
 0x6b0   : > { %v1915_v8 = vpop.f32.mrf.mxu1 }
 0x6b1   : > { %2127 = vrot.lane.b32.xlu1 %v1915_v8, %s5284_s30 }
 0x6b2   : > { %v4680_v12 = vpop.f32.mrf.mxu1 }
 0x6b4   : > { %v1918_v6 = vpop.f32.mrf.mxu1 }
 0x6b5   : > { %2167 = vrot.lane.b32.xlu1 %v5479_v10, %s5283_s29 }
 0x6b6   : > { %v4681_v18 = vpop.f32.mrf.mxu1 }
 0x6b9   : > { %2171 = vrot.lane.b32.xlu1 %v5513_v19, %s5283_s29 }
 0x6db   : > { %v1963_v55 = vpop.f32.mrf.mxu0 }
 0x6dc   : > { %2129 = vrot.lane.b32.xlu0 %v1963_v55, %s5284_s30 }
 0x6dd   : > { %v4686_v15 = vpop.f32.mrf.mxu0 }
 0x6df   : > { %v1966_v46 = vpop.f32.mrf.mxu0 }
 0x6e1   : > { %v4687_v62 = vpop.f32.mrf.mxu0 }
 0x6e3   : > { %v2059_v63 = vpop.f32.mrf.mxu0 }
 0x6e4   : > { %2133 = vrot.lane.b32.xlu0 %v2059_v63, %s5284_s30 }
 0x6e5   : > { %v2011_v1 = vpop.f32.mrf.mxu1  ;;  %v4698_v2 = vpop.f32.mrf.mxu0 }
 0x6e6   : > { %2131 = vrot.lane.b32.xlu1 %v2011_v1, %s5284_s30 }
 0x6e7   : > { %v4692_v7 = vpop.f32.mrf.mxu1  ;;  %v2062_v13 = vpop.f32.mrf.mxu0 }
 0x6e8   : > { %2173 = vrot.lane.b32.xlu0 %v5495_v14, %s5283_s29 }
 0x6e9   : > { %v2014_v10 = vpop.f32.mrf.mxu1  ;;  %v4699_v19 = vpop.f32.mrf.mxu0 }
 0x6eb   : > { %v4693_v3 = vpop.f32.mrf.mxu1 }
 0x6ed   : > { %v2107_v23 = vpop.f32.mrf.mxu1 }
 0x6ee   : > { %2135 = vrot.lane.b32.xlu1 %v2107_v23, %s5284_s30 }
 0x6ef   : > { %v4704_v40 = vpop.f32.mrf.mxu1 }
 0x6f1   : > { %v2110_v35 = vpop.f32.mrf.mxu1 }
 0x6f2   : > { %2175 = vrot.lane.b32.xlu1 %v5505_v17, %s5283_s29 }
 0x6f3   : > { %v4705_v24 = vpop.f32.mrf.mxu1 }
 0x70d   : > { %v2122_v26 = vpop.permute.xlu0 %2121 }
 0x70e   : > { %v2145_v25 = vsel %vm346_vm2, %v5768_v43, %v2122_v26 }
 0x70f   : > { %v2185_v30 = vadd.f32 %v2162_v58, %v2145_v25 }
 0x711   : > { %v2193_v22 = vmax.f32 %v2185_v30, 0.0 }
 0x715   : > { %v2126_v31 = vpop.permute.xlu0 %2125 }
 0x716   : > { %v2147_v41 = vsel %vm346_vm2, %v5772_v0, %v2126_v31 }
 0x719   : > { %v2166_v34 = vpop.permute.xlu0 %2165 }
 0x71a   : > { %v2187_v9 = vadd.f32 %v2166_v34, %v2147_v41 }
 0x71b   : > { %v2124_v14 = vpop.permute.xlu1 %2123 }
 0x71c   : > { %v2146_v32 = vsel %vm346_vm2, %v5770_v56, %v2124_v14  ;;  %v2195_v45 = vmax.f32 %v2187_v9, 0.0 }
 0x71d   : > { %v2186_v59 = vadd.f32 %v2164_v27, %v2146_v32  ;;  %v2170_v20 = vpop.permute.xlu0 %2169 }
 0x71f   : > { %v2194_v37 = vmax.f32 %v2186_v59, 0.0 }
 0x721   : > { %v2201_v38 = vpack.c.bf16 %v2194_v37, %v2193_v22 }
 0x723   : > { %4708 = vmatprep.mubr.msk.bf16.mxu0 %vm257_vm0, %v2201_v38  ;;  %v2128_v17 = vpop.permute.xlu1 %2127 }
 0x724   : > { %v2148_v43 = vsel %vm346_vm2, %v5774_v4, %v2128_v17 }
 0x727   : > { %v2168_v16 = vpop.permute.xlu1 %2167 }
 0x728   : > { %v2188_v42 = vadd.f32 %v2168_v16, %v2148_v43 }
 0x72a   : > { %v2196_v56 = vmax.f32 %v2188_v42, 0.0 }
 0x72b   : > { %v2172_v11 = vpop.permute.xlu1 %2171 }
 0x72c   : > { %v2202_v47 = vpack.c.bf16 %v2196_v56, %v2195_v45 }
 0x72e   : > { %4709 = vmatmul.mubr.msk.bf16.vlgmr.msra.gmra.mxu0 %vm257_vm0, %v2202_v47 }
 0x74e   : > { %v2130_v61 = vpop.permute.xlu0 %2129 }
 0x74f   : > { %v2149_v29 = vsel %vm346_vm2, %v5778_v33, %v2130_v61 }
 0x750   : > { %v2189_v39 = vadd.f32 %v2170_v20, %v2149_v29 }
 0x752   : > { %v2197_v52 = vmax.f32 %v2189_v39, 0.0 }
 0x756   : > { %v2134_v51 = vpop.permute.xlu0 %2133 }
 0x757   : > { %v2151_v21 = vsel %vm346_vm2, %v5780_v36, %v2134_v51 }
 0x758   : > { %v2132_v49 = vpop.permute.xlu1 %2131 }
 0x759   : > { %v2150_v0 = vsel %vm346_vm2, %v5776_v28, %v2132_v49 }
 0x75a   : > { %v2190_v4 = vadd.f32 %v2172_v11, %v2150_v0  ;;  %v2174_v54 = vpop.permute.xlu0 %2173 }
 0x75b   : > { %v2191_v50 = vadd.f32 %v2174_v54, %v2151_v21 }
 0x75c   : > { %v2198_v48 = vmax.f32 %v2190_v4, 0.0 }
 0x75d   : > { %v2199_v12 = vmax.f32 %v2191_v50, 0.0 }
 0x75e   : > { %v2203_v53 = vpack.c.bf16 %v2198_v48, %v2197_v52 }
 0x760   : > { %4712 = vmatprep.mubr.msk.bf16.mxu0 %vm257_vm0, %v2203_v53  ;;  %v2136_v57 = vpop.permute.xlu1 %2135 }
 0x761   : > { %v2152_v33 = vsel %vm346_vm2, %v5786_v44, %v2136_v57 }
 0x764   : > { %v2176_v60 = vpop.permute.xlu1 %2175 }
 0x765   : > { %v2192_v8 = vadd.f32 %v2176_v60, %v2152_v33 }
 0x767   : > { %v2200_v28 = vmax.f32 %v2192_v8, 0.0 }
 0x769   : > { %v2204_v6 = vpack.c.bf16 %v2200_v28, %v2199_v12 }
 0x76b   : > { %4713 = vmatmul.mubr.msk.bf16.gmra.mxu0 %vm257_vm0, %v2204_v6 }
 0x76c   : > { %4730 = vmatprep.mubr.msk.bf16.mxu0 %vm5277_vm1, %v5276_v5 }
 0x7ee   : > { %v5940_v18 = vpop.f32.mrf.mxu0 }
 0x7ef   : > { %v5956_v46 = vpack.c.bf16 %v5940_v18, %v5940_v18 }
 0x7f0   : > { %v5942_v55 = vpop.f32.mrf.mxu0 }
 0x7f1   : > { %v5946_v36 = vpack.c.bf16 %v5942_v55, %v5942_v55 }
 0x7f2   : > { %v5948_v15 = vpop.f32.mrf.mxu0 }
 0x7f3   : > { %2299 = vrot.lane.b32.xlu0 %v5946_v36, %s5278_s18  ;;  %v5968_v63 = vpack.c.bf16 %v5948_v15, %v5948_v15 }
 0x7f4   : > { %v5952_v44 = vpop.f32.mrf.mxu0 }
 0x7f5   : > { %v5960_v62 = vpack.c.bf16 %v5952_v44, %v5952_v44 }
 0x7f7   : > { %2397 = vrot.lane.b32.xlu0 %v5956_v46, %s5278_s18  ;;  %2348 = vrot.lane.b32.xlu1 %v5960_v62, %s5278_s18 }
 0x7fb   : > { %2446 = vrot.lane.b32.xlu1 %v5968_v63, %s5278_s18 }
 0x82b   : > { %v5972_v1 = vpop.f32.mrf.mxu0 }
 0x82c   : > { %v5988_v19 = vpack.c.bf16 %v5972_v1, %v5972_v1 }
 0x82d   : > { %v5974_v2 = vpop.f32.mrf.mxu0 }
 0x82e   : > { %v5978_v7 = vpack.c.bf16 %v5974_v2, %v5974_v2 }
 0x82f   : > { %v5980_v13 = vpop.f32.mrf.mxu0 }
 0x830   : > { %2495 = vrot.lane.b32.xlu0 %v5978_v7, %s5278_s18  ;;  %v6000_v23 = vpack.c.bf16 %v5980_v13, %v5980_v13 }
 0x831   : > { %v5984_v10 = vpop.f32.mrf.mxu0 }
 0x832   : > { %v5992_v3 = vpack.c.bf16 %v5984_v10, %v5984_v10 }
 0x834   : > { %2593 = vrot.lane.b32.xlu0 %v5988_v19, %s5278_s18  ;;  %2544 = vrot.lane.b32.xlu1 %v5992_v3, %s5278_s18 }
 0x838   : > { %2842 = vrot.lane.b32.xlu0 %v5960_v62, %s5279_s20  ;;  %2642 = vrot.lane.b32.xlu1 %v6000_v23, %s5278_s18  ;;  %s5207_s18 = scalar_lea.vmem %s5206_s9, 2048 }
 0x839   : > { %p5209_p0 = scmp.lt.s32.totalorder %s5207_s18, %s5201_s6 }
 0x83b   : > { %p5210_p10 = por %p5209_p0, %p5208_p13 }
 0x83c   : > { %2794 = vrot.lane.b32.xlu1 %v5946_v36, %s5279_s20 }
 0x83d   : > { %p5211_p3 = pnand %p5210_p10, %p5204_p12 }
 0x840   : > { %2890 = vrot.lane.b32.xlu1 %v5956_v46, %s5279_s20 }
 0x844   : > { %2938 = vrot.lane.b32.xlu1 %v5968_v63, %s5279_s20 }
 0x865   : > { %v2300_v40 = vpop.permute.xlu0 %2299 }
 0x866   : > { %v2305_v35 = vsel %vm346_vm2, %v2300_v40, 0 }
 0x867   : > { %4717 = vmatpush3.bf16.xpose.msra.mxu1 %v2305_v35 }
 0x868   : > { %4722 = vmatprep.subr.bf16.mxu1 %v5276_v5 }
 0x869   : > { %v2398_v24 = vpop.permute.xlu0 %2397  ;;  %v2349_v26 = vpop.permute.xlu1 %2348 }
 0x86a   : > { %v2403_v58 = vsel %vm346_vm2, %v2398_v24, 0  ;;  %v2354_v27 = vsel %vm346_vm2, %v2349_v26, 0 }
 0x86b   : > { %4729 = vmatpush3.bf16.xpose.msra.mxu0 %v2403_v58 }
 0x86c   : > { %4740 = vmatprep.subr.bf16.mxu0 %v5276_v5 }
 0x86d   : > { %v2447_v25 = vpop.permute.xlu1 %2446 }
 0x86e   : > { %4719 = vmatmul.mubr.msk.bf16.vlgmr.msra.gmra.mxu1 %vm346_vm2, %v5946_v36  ;;  %v2452_v30 = vsel %vm346_vm2, %v2447_v25, 0 }
 0x86f   : > { %4723 = vmatpush3.bf16.xpose.msra.mxu1 %v2354_v27  ;;  %4724 = vmatprep.mubr.msk.bf16.mxu1 %vm5277_vm1, %v5276_v5 }
 0x870   : > { %4734 = vmatprep.subr.bf16.mxu1 %v5276_v5 }
 0x872   : > { %4731 = vmatmul.mubr.msk.bf16.vlgmr.msra.gmra.mxu0 %vm346_vm2, %v5956_v46 }
 0x873   : > { %4742 = vmatprep.mubr.msk.bf16.mxu0 %vm5277_vm1, %v5276_v5 }
 0x876   : > { %4725 = vmatmul.mubr.msk.bf16.vlgmr.msra.gmra.mxu1 %vm346_vm2, %v5960_v62 }
 0x877   : > { %4735 = vmatpush3.bf16.xpose.msra.mxu1 %v2452_v30  ;;  %4736 = vmatprep.mubr.msk.bf16.mxu1 %vm5277_vm1, %v5276_v5 }
 0x878   : > { %4746 = vmatprep.subr.bf16.mxu1 %v5276_v5 }
 0x87e   : > { %4737 = vmatmul.mubr.msk.bf16.vlgmr.msra.gmra.mxu1 %vm346_vm2, %v5968_v63 }
 0x87f   : > { %4748 = vmatprep.mubr.msk.bf16.mxu1 %vm5277_vm1, %v5276_v5 }
 0x8a2   : > { %v2496_v14 = vpop.permute.xlu0 %2495 }
 0x8a3   : > { %v2501_v32 = vsel %vm346_vm2, %v2496_v14, 0 }
 0x8a4   : > { %4741 = vmatpush3.bf16.xpose.msra.mxu0 %v2501_v32 }
 0x8a5   : > { %4752 = vmatprep.subr.bf16.mxu0 %v5276_v5 }
 0x8a6   : > { %v2545_v31 = vpop.permute.xlu1 %2544  ;;  %v2594_v22 = vpop.permute.xlu0 %2593 }
 0x8a7   : > { %v2550_v59 = vsel %vm346_vm2, %v2545_v31, 0  ;;  %v2599_v38 = vsel %vm346_vm2, %v2594_v22, 0 }
 0x8a8   : > { %4747 = vmatpush3.bf16.xpose.msra.mxu1 %v2550_v59 }
 0x8a9   : > { %4758 = vmatprep.subr.bf16.mxu1 %v5276_v5 }
 0x8aa   : > { %v2643_v37 = vpop.permute.xlu1 %2642  ;;  %v2843_v9 = vpop.permute.xlu0 %2842 }
 0x8ab   : > { %4743 = vmatmul.mubr.msk.bf16.vlgmr.msra.gmra.mxu0 %vm346_vm2, %v5978_v7  ;;  %v2648_v34 = vsel %vm346_vm2, %v2643_v37, 0  ;;  %v2848_v43 = vsel %vm845_vm3, %v2843_v9, 0 }
 0x8ac   : > { %4753 = vmatpush3.bf16.xpose.msra.mxu0 %v2599_v38  ;;  %4754 = vmatprep.mubr.msk.bf16.mxu0 %vm5277_vm1, %v5276_v5 }
 0x8ad   : > { %4764 = vmatprep.subr.bf16.mxu0 %v5276_v5 }
 0x8ae   : > { %v2795_v17 = vpop.permute.xlu1 %2794 }
 0x8af   : > { %4749 = vmatmul.mubr.msk.bf16.vlgmr.msra.gmra.mxu1 %vm346_vm2, %v5992_v3  ;;  %v2800_v41 = vsel %vm845_vm3, %v2795_v17, 0 }
 0x8b0   : > { %4759 = vmatpush3.bf16.xpose.msra.mxu1 %v2648_v34  ;;  %4760 = vmatprep.mubr.msk.bf16.mxu1 %vm5277_vm1, %v5276_v5 }
 0x8b1   : > { %4770 = vmatprep.subr.bf16.mxu1 %v5276_v5 }
 0x8b3   : > { %4755 = vmatmul.mubr.msk.bf16.vlgmr.msra.gmra.mxu0 %vm346_vm2, %v5988_v19 }
 0x8b4   : > { %4765 = vmatpush3.bf16.msra.mxu0 %v2800_v41  ;;  %4766 = vmatprep.mubr.msk.bf16.mxu0 %vm5277_vm1, %v5276_v5 }
 0x8b5   : > { %4776 = vmatprep.subr.bf16.mxu0 %v5276_v5 }
 0x8b7   : > { %4761 = vmatmul.mubr.msk.bf16.vlgmr.msra.gmra.mxu1 %vm346_vm2, %v6000_v23 }
 0x8b8   : > { %4771 = vmatpush3.bf16.msra.mxu1 %v2848_v43  ;;  %4772 = vmatprep.mubr.msk.bf16.mxu1 %vm5277_vm1, %v5276_v5 }
 0x8b9   : > { %4782 = vmatprep.subr.bf16.mxu1 %v5276_v5 }
 0x92e   : > { %v2341_v16 = vpop.f32.mrf.mxu1 }
 0x92f   : > { %v2690_v11 = vmul.f32 0.35355338, %v2341_v16 }
 0x930   : > { %v4720_v42 = vpop.f32.mrf.mxu1 }
 0x931   : > { %v2698_v52 = vsel %vm346_vm2, %v2690_v11, -inf  ;;  %v6079_v42 = vpop.permute.xlu1 %2890 }
 0x932   : > { %v2344_v45 = vpop.f32.mrf.mxu1  ;;  %v2439_v56 = vpop.f32.mrf.mxu0 }
 0x933   : > { %v2692_v47 = vmul.f32 0.35355338, %v2439_v56 }
 0x934   : > { %v4721_v20 = vpop.f32.mrf.mxu1  ;;  %v4732_v61 = vpop.f32.mrf.mxu0 }
 0x935   : > { %v2704_v29 = vsel %vm346_vm2, %v2692_v47, -inf  ;;  %v6081_v45 = vpop.permute.xlu1 %2938 }
 0x936   : > { %2705 = vmax.xlane.f32.xlu0 %v2704_v29  ;;  %v2390_v39 = vpop.f32.mrf.mxu1  ;;  %v2442_v49 = vpop.f32.mrf.mxu0 }
 0x937   : > { %v2691_v0 = vmul.f32 0.35355338, %v2390_v39 }
 0x938   : > { %v4726_v51 = vpop.f32.mrf.mxu1  ;;  %v4733_v4 = vpop.f32.mrf.mxu0 }
 0x939   : > { %v2701_v48 = vsel %vm346_vm2, %v2691_v0, -inf }
 0x93a   : > { %2699 = vmax.xlane.f32.xlu0 %v2698_v52  ;;  %2702 = vmax.xlane.f32.xlu1 %v2701_v48  ;;  %v2393_v53 = vpop.f32.mrf.mxu1 }
 0x93c   : > { %v4727_v54 = vpop.f32.mrf.mxu1 }
 0x93e   : > { %v2488_v57 = vpop.f32.mrf.mxu1 }
 0x93f   : > { %v2693_v21 = vmul.f32 0.35355338, %v2488_v57 }
 0x940   : > { %v4738_v50 = vpop.f32.mrf.mxu1 }
 0x941   : > { %v2707_v33 = vsel %vm346_vm2, %v2693_v21, -inf }
 0x942   : > { %2708 = vmax.xlane.f32.xlu0 %v2707_v33  ;;  %v2491_v60 = vpop.f32.mrf.mxu1 }
 0x944   : > { %v4739_v8 = vpop.f32.mrf.mxu1 }
 0x96b   : > { %v2537_v12 = vpop.f32.mrf.mxu0 }
 0x96c   : > { %v2694_v28 = vmul.f32 0.35355338, %v2537_v12 }
 0x96d   : > { %v4744_v6 = vpop.f32.mrf.mxu0 }
 0x96e   : > { %v2710_v40 = vsel %vm346_vm2, %v2694_v28, -inf }
 0x96f   : > { %v2540_v35 = vpop.f32.mrf.mxu0  ;;  %2711 = vmax.xlane.f32.xlu1 %v2710_v40  ;;  %v2586_v24 = vpop.f32.mrf.mxu1 }
 0x970   : > { %v2695_v58 = vmul.f32 0.35355338, %v2586_v24 }
 0x971   : > { %v4745_v26 = vpop.f32.mrf.mxu0  ;;  %v4750_v27 = vpop.f32.mrf.mxu1 }
 0x972   : > { %v2713_v25 = vsel %vm346_vm2, %v2695_v58, -inf }
 0x973   : > { %v2635_v30 = vpop.f32.mrf.mxu0  ;;  %2714 = vmax.xlane.f32.xlu0 %v2713_v25  ;;  %v2589_v14 = vpop.f32.mrf.mxu1 }
 0x974   : > { %v6070_v32 = vmul.f32 0.35355338, %v2635_v30 }
 0x975   : > { %v4751_v31 = vpop.f32.mrf.mxu1  ;;  %v4756_v59 = vpop.f32.mrf.mxu0 }
 0x976   : > { %v2716_v22 = vsel %vm346_vm2, %v6070_v32, -inf }
 0x977   : > { %v2638_v37 = vpop.f32.mrf.mxu0  ;;  %2717 = vmax.xlane.f32.xlu1 %v2716_v22  ;;  %v2684_v38 = vpop.f32.mrf.mxu1 }
 0x978   : > { %v2697_v34 = vmul.f32 0.35355338, %v2684_v38 }
 0x979   : > { %v4757_v17 = vpop.f32.mrf.mxu0  ;;  %v4762_v41 = vpop.f32.mrf.mxu1 }
 0x97a   : > { %v2719_v9 = vsel %vm346_vm2, %v2697_v34, -inf }
 0x97b   : > { %2720 = vmax.xlane.f32.xlu0 %v2719_v9  ;;  %v2687_v43 = vpop.f32.mrf.mxu1 }
 0x97d   : > { %v4763_v16 = vpop.f32.mrf.mxu1 }
 0x988   : > { %3034 = vrot.lane.b32.xlu1 %v5992_v3, %s5279_s20 }
 0x991   : > { %2986 = vrot.lane.b32.xlu0 %v5978_v7, %s5279_s20 }
 0x9bf   : > { %v2706_v56 = vpop.xlane.xlu0 %2705 }
 0x9c0   : > { %v2724_v20 = vsub.f32 %v2692_v47, %v2706_v56 }
 0x9c2   : > { %v2734_v61 = vmul.f32 1.442695, %v2724_v20 }
 0x9c3   : > { %v2700_v29 = vpop.xlane.xlu0 %2699  ;;  %v2703_v39 = vpop.xlane.xlu1 %2702 }
 0x9c4   : > { %5057 = vpow2.f32 %v2734_v61  ;;  %v2722_v49 = vsub.f32 %v2690_v11, %v2700_v29  ;;  %v2723_v51 = vsub.f32 %v2691_v0, %v2703_v39 }
 0x9c6   : > { %v2730_v4 = vmul.f32 1.442695, %v2722_v49  ;;  %v2732_v52 = vmul.f32 1.442695, %v2723_v51 }
 0x9c8   : > { %5059 = vpow2.f32 %v2730_v4 }
 0x9c9   : > { %5061 = vpow2.f32 %v2732_v52  ;;  %v2896_v52 = vsel %vm845_vm3, %v6079_v42, 0 }
 0x9cb   : > { %v2709_v48 = vpop.xlane.xlu0 %2708 }
 0x9cc   : > { %v2725_v53 = vsub.f32 %v2693_v21, %v2709_v48  ;;  %v2944_v48 = vsel %vm845_vm3, %v6081_v45, 0 }
 0x9ce   : > { %v2736_v54 = vmul.f32 1.442695, %v2725_v53 }
 0x9d0   : > { %5063 = vpow2.f32 %v2736_v54 }
 0x9d1   : > { %v6083_v57 = vpop.eup %5057 }
 0x9d2   : > { %v2752_v50 = vsel %vm346_vm2, %v6083_v57, 0.0 }
 0x9d3   : > { %2753 = vadd.xlane.f32.xlu1 %v2752_v50 }
 0x9d5   : > { %v6087_v47 = vpop.eup %5059 }
 0x9d6   : > { %v6089_v33 = vpop.eup %5061  ;;  %v2746_v11 = vsel %vm346_vm2, %v6087_v47, 0.0 }
 0x9d7   : > { %2747 = vadd.xlane.f32.xlu1 %v2746_v11  ;;  %v2749_v0 = vsel %vm346_vm2, %v6089_v33, 0.0 }
 0x9d8   : > { %2750 = vadd.xlane.f32.xlu0 %v2749_v0 }
 0x9dd   : > { %v6095_v21 = vpop.eup %5063 }
 0x9de   : > { %v2755_v60 = vsel %vm346_vm2, %v6095_v21, 0.0 }
 0x9df   : > { %2756 = vadd.xlane.f32.xlu0 %v2755_v60 }
 0x9f8   : > { %v2712_v8 = vpop.xlane.xlu1 %2711 }
 0x9f9   : > { %v2726_v12 = vsub.f32 %v2694_v28, %v2712_v8 }
 0x9fb   : > { %v2738_v6 = vmul.f32 1.442695, %v2726_v12 }
 0x9fc   : > { %v2715_v40 = vpop.xlane.xlu0 %2714 }
 0x9fd   : > { %5065 = vpow2.f32 %v2738_v6  ;;  %v2727_v35 = vsub.f32 %v2695_v58, %v2715_v40 }
 0x9ff   : > { %v2740_v24 = vmul.f32 1.442695, %v2727_v35 }
 0xa00   : > { %v2718_v28 = vpop.xlane.xlu1 %2717 }
 0xa01   : > { %5067 = vpow2.f32 %v2740_v24  ;;  %v2728_v58 = vsub.f32 %v6070_v32, %v2718_v28 }
 0xa03   : > { %v2742_v31 = vmul.f32 1.442695, %v2728_v58 }
 0xa04   : > { %v2721_v14 = vpop.xlane.xlu0 %2720  ;;  %v3035_v32 = vpop.permute.xlu1 %3034 }
 0xa05   : > { %v2729_v59 = vsub.f32 %v2697_v34, %v2721_v14  ;;  %5069 = vpow2.f32 %v2742_v31 }
 0xa07   : > { %v2744_v22 = vmul.f32 1.442695, %v2729_v59 }
 0xa08   : > { %v2987_v9 = vpop.permute.xlu0 %2986 }
 0xa09   : > { %5071 = vpow2.f32 %v2744_v22  ;;  %v2992_v50 = vsel %vm845_vm3, %v2987_v9, 0 }
 0xa0a   : > { %v6099_v26 = vpop.eup %5065 }
 0xa0b   : > { %v2758_v27 = vsel %vm346_vm2, %v6099_v26, 0.0 }
 0xa0c   : > { %2759 = vadd.xlane.f32.xlu1 %v2758_v27 }
 0xa0e   : > { %v6103_v25 = vpop.eup %5067 }
 0xa0f   : > { %v2761_v30 = vsel %vm346_vm2, %v6103_v25, 0.0 }
 0xa10   : > { %2762 = vadd.xlane.f32.xlu0 %v2761_v30 }
 0xa12   : > { %v6112_v37 = vpop.eup %5069 }
 0xa13   : > { %v2764_v38 = vsel %vm346_vm2, %v6112_v37, 0.0 }
 0xa16   : > { %v6116_v17 = vpop.eup %5071 }
 0xa17   : > { %v2767_v41 = vsel %vm346_vm2, %v6116_v17, 0.0 }
 0xa1d   : > { %3130 = vrot.lane.b32.xlu1 %v6000_v23, %s5279_s20 }
 0xa26   : > { %3082 = vrot.lane.b32.xlu0 %v5988_v19, %s5279_s20 }
 0xa41   : > { %2765 = vadd.xlane.f32.xlu1 %v2764_v38 }
 0xa45   : > { %2768 = vadd.xlane.f32.xlu0 %v2767_v41 }
 0xa52   : > { %3230 = vrot.lane.b32.xlu1 %v5960_v62, %s5280_s27 }
 0xa56   : > { %3228 = vrot.lane.b32.xlu1 %v5960_v62, %s5281_s28 }
 0xa5a   : > { %3330 = vrot.lane.b32.xlu1 %v5968_v63, %s5280_s27 }
 0xa5b   : > { %3180 = vrot.lane.b32.xlu0 %v5946_v36, %s5280_s27 }
 0xa5c   : > { %v2754_v34 = vpop.xlane.xlu1 %2753 }
 0xa5e   : > { %3328 = vrot.lane.b32.xlu1 %v5968_v63, %s5281_s28 }
 0xa5f   : > { %3178 = vrot.lane.b32.xlu0 %v5946_v36, %s5281_s28 }
 0xa60   : > { %v2748_v43 = vpop.xlane.xlu1 %2747 }
 0xa61   : > { %v2751_v16 = vpop.xlane.xlu0 %2750  ;;  %5073 = vrcp.f32 %v2748_v43 }
 0xa62   : > { %5075 = vrcp.f32 %v2751_v16  ;;  %3430 = vrot.lane.b32.xlu1 %v5992_v3, %s5280_s27 }
 0xa63   : > { %3280 = vrot.lane.b32.xlu0 %v5956_v46, %s5280_s27  ;;  %5077 = vrcp.f32 %v2754_v34 }
 0xa66   : > { %3428 = vrot.lane.b32.xlu1 %v5992_v3, %s5281_s28 }
 0xa67   : > { %3278 = vrot.lane.b32.xlu0 %v5956_v46, %s5281_s28 }
 0xa68   : > { %v2757_v56 = vpop.xlane.xlu0 %2756 }
 0xa69   : > { %5079 = vrcp.f32 %v2757_v56 }
 0xa6a   : > { %3530 = vrot.lane.b32.xlu1 %v6000_v23, %s5280_s27 }
 0xa6b   : > { %3380 = vrot.lane.b32.xlu0 %v5978_v7, %s5280_s27 }
 0xa6e   : > { %v5074_v20 = vpop.eup %5073  ;;  %3528 = vrot.lane.b32.xlu1 %v6000_v23, %s5281_s28 }
 0xa6f   : > { %v5076_v61 = vpop.eup %5075  ;;  %3378 = vrot.lane.b32.xlu0 %v5978_v7, %s5281_s28  ;;  %v2778_v29 = vmul.f32 %v5074_v20, %v6087_v47 }
 0xa70   : > { %v2779_v39 = vmul.f32 %v5076_v61, %v6089_v33  ;;  %v5078_v51 = vpop.eup %5077 }
 0xa71   : > { %v2786_v49 = vpack.c.bf16 %v2778_v29, %v2778_v29 }
 0xa72   : > { %3682 = vrot.lane.b32.xlu1 %v5946_v36, %s5282_s25  ;;  %v2787_v4 = vpack.c.bf16 %v2779_v39, %v2779_v39  ;;  %v2780_v36 = vmul.f32 %v5078_v51, %v6083_v57  ;;  %v3040_v57 = vsel %vm845_vm3, %v3035_v32, 0 }
 0xa73   : > { %3480 = vrot.lane.b32.xlu0 %v5988_v19, %s5280_s27  ;;  %4767 = vmatmul.mubr.msk.bf16.vlgmr.msra.gmra.mxu0 %vm346_vm2, %v2786_v49 }
 0xa74   : > { %4773 = vmatmul.mubr.msk.bf16.vlgmr.msra.gmra.mxu1 %vm346_vm2, %v2787_v4  ;;  %4777 = vmatpush3.bf16.msra.mxu0 %v2896_v52  ;;  %v2788_v45 = vpack.c.bf16 %v2780_v36, %v2780_v36 }
 0xa75   : > { %4783 = vmatpush3.bf16.msra.mxu1 %v2944_v48  ;;  %4778 = vmatprep.mubr.msk.bf16.mxu0 %vm5277_vm1, %v5276_v5 }
 0xa76   : > { %v5080_v53 = vpop.eup %5079  ;;  %4784 = vmatprep.mubr.msk.bf16.mxu1 %vm5277_vm1, %v5276_v5  ;;  %4788 = vmatprep.subr.bf16.mxu0 %v5276_v5 }
 0xa77   : > { %3478 = vrot.lane.b32.xlu0 %v5988_v19, %s5281_s28  ;;  %4794 = vmatprep.subr.bf16.mxu1 %v5276_v5  ;;  %v2781_v42 = vmul.f32 %v5080_v53, %v6095_v21 }
 0xa79   : > { %v2789_v54 = vpack.c.bf16 %v2781_v42, %v2781_v42 }
 0xa7b   : > { %4779 = vmatmul.mubr.msk.bf16.vlgmr.msra.gmra.mxu0 %vm346_vm2, %v2788_v45 }
 0xa7c   : > { %4785 = vmatmul.mubr.msk.bf16.vlgmr.msra.gmra.mxu1 %vm346_vm2, %v2789_v54  ;;  %4789 = vmatpush3.bf16.msra.mxu0 %v2992_v50 }
 0xa7d   : > { %4795 = vmatpush3.bf16.msra.mxu1 %v3040_v57  ;;  %4790 = vmatprep.mubr.msk.bf16.mxu0 %vm5277_vm1, %v5276_v5 }
 0xa7e   : > { %4800 = vmatprep.subr.bf16.mxu0 %v5276_v5  ;;  %4796 = vmatprep.mubr.msk.bf16.mxu1 %vm5277_vm1, %v5276_v5 }
 0xa7f   : > { %4806 = vmatprep.subr.bf16.mxu1 %v5276_v5 }
 0xa95   : > { %v2760_v47 = vpop.xlane.xlu1 %2759 }
 0xa96   : > { %5081 = vrcp.f32 %v2760_v47 }
 0xa99   : > { %v2763_v33 = vpop.xlane.xlu0 %2762  ;;  %v3131_v40 = vpop.permute.xlu1 %3130 }
 0xa9a   : > { %5083 = vrcp.f32 %v2763_v33  ;;  %v3136_v24 = vsel %vm845_vm3, %v3131_v40, 0 }
 0xa9d   : > { %v3083_v21 = vpop.permute.xlu0 %3082 }
 0xa9e   : > { %v3088_v12 = vsel %vm845_vm3, %v3083_v21, 0 }
 0xaa3   : > { %v5082_v11 = vpop.eup %5081 }
 0xaa4   : > { %v2782_v0 = vmul.f32 %v5082_v11, %v6099_v26 }
 0xaa6   : > { %v2790_v60 = vpack.c.bf16 %v2782_v0, %v2782_v0 }
 0xaa7   : > { %v5084_v8 = vpop.eup %5083 }
 0xaa8   : > { %4791 = vmatmul.mubr.msk.bf16.vlgmr.msra.gmra.mxu0 %vm346_vm2, %v2790_v60  ;;  %v2783_v6 = vmul.f32 %v5084_v8, %v6103_v25 }
 0xaa9   : > { %4801 = vmatpush3.bf16.msra.mxu0 %v3088_v12  ;;  %4802 = vmatprep.mubr.msk.bf16.mxu0 %vm5277_vm1, %v5276_v5 }
 0xaaa   : > { %v2791_v35 = vpack.c.bf16 %v2783_v6, %v2783_v6  ;;  %4812 = vmatprep.subr.bf16.mxu0 %v5276_v5 }
 0xaac   : > { %4797 = vmatmul.mubr.msk.bf16.vlgmr.msra.gmra.mxu1 %vm346_vm2, %v2791_v35 }
 0xaad   : > { %4807 = vmatpush3.bf16.msra.mxu1 %v3136_v24  ;;  %4808 = vmatprep.mubr.msk.bf16.mxu1 %vm5277_vm1, %v5276_v5 }
 0xaae   : > { %4818 = vmatprep.subr.bf16.mxu1 %v5276_v5 }
 0xaca   : > { %v2766_v26 = vpop.xlane.xlu1 %2765 }
 0xacb   : > { %5085 = vrcp.f32 %v2766_v26 }
 0xace   : > { %v2769_v27 = vpop.xlane.xlu0 %2768  ;;  %v3231_v25 = vpop.permute.xlu1 %3230 }
 0xacf   : > { %5087 = vrcp.f32 %v2769_v27 }
 0xad2   : > { %v3181_v30 = vpop.permute.xlu0 %3180  ;;  %v3229_v28 = vpop.permute.xlu1 %3228 }
 0xad3   : > { %v3186_v34 = vsel %vm346_vm2, %v3181_v30, 0 }
 0xad6   : > { %v3179_v58 = vpop.permute.xlu0 %3178  ;;  %v3331_v14 = vpop.permute.xlu1 %3330 }
 0xad7   : > { %v3336_v29 = vsel %vm346_vm2, %v3331_v14, 0 }
 0xad8   : > { %v5086_v31 = vpop.eup %5085 }
 0xad9   : > { %v2784_v59 = vmul.f32 %v5086_v31, %v6112_v37  ;;  %v3236_v37 = vsel %vm346_vm2, %v3231_v25, 0 }
 0xada   : > { %v3281_v22 = vpop.permute.xlu0 %3280  ;;  %v3329_v32 = vpop.permute.xlu1 %3328 }
 0xadb   : > { %v2792_v38 = vpack.c.bf16 %v2784_v59, %v2784_v59 }
 0xadc   : > { %v5088_v41 = vpop.eup %5087 }
 0xadd   : > { %4803 = vmatmul.mubr.msk.bf16.vlgmr.msra.gmra.mxu0 %vm346_vm2, %v2792_v38  ;;  %v2785_v9 = vmul.f32 %v5088_v41, %v6116_v17  ;;  %v3286_v17 = vsel %vm346_vm2, %v3281_v22, 0 }
 0xade   : > { %4813 = vmatpush3.bf16.xpose.msra.mxu0 %v3186_v34  ;;  %4814 = vmatprep.mubr.msk.bf16.mxu0 %vm5277_vm1, %v5276_v5  ;;  %v3279_v16 = vpop.permute.xlu0 %3278  ;;  %v3431_v56 = vpop.permute.xlu1 %3430 }
 0xadf   : > { %v2793_v43 = vpack.c.bf16 %v2785_v9, %v2785_v9  ;;  %4824 = vmatprep.subr.bf16.mxu0 %v5276_v5  ;;  %v3436_v4 = vsel %vm346_vm2, %v3431_v56, 0 }
 0xae1   : > { %4809 = vmatmul.mubr.msk.bf16.vlgmr.msra.gmra.mxu1 %vm346_vm2, %v2793_v43 }
 0xae2   : > { %4819 = vmatpush3.bf16.xpose.msra.mxu1 %v3236_v37  ;;  %4820 = vmatprep.mubr.msk.bf16.mxu1 %vm5277_vm1, %v5276_v5  ;;  %v3381_v20 = vpop.permute.xlu0 %3380  ;;  %v3429_v61 = vpop.permute.xlu1 %3428 }
 0xae3   : > { %4830 = vmatprep.subr.bf16.mxu1 %v5276_v5  ;;  %v3386_v49 = vsel %vm346_vm2, %v3381_v20, 0 }
 0xae5   : > { %4815 = vmatmul.mubr.msk.bf16.vlgmr.msra.gmra.mxu0 %vm346_vm2, %v3179_v58 }
 0xae6   : > { %4825 = vmatpush3.bf16.xpose.msra.mxu0 %v3286_v17  ;;  %4826 = vmatprep.mubr.msk.bf16.mxu0 %vm5277_vm1, %v5276_v5  ;;  %v3379_v39 = vpop.permute.xlu0 %3378  ;;  %v3531_v51 = vpop.permute.xlu1 %3530 }
 0xae7   : > { %4836 = vmatprep.subr.bf16.mxu0 %v5276_v5  ;;  %v3536_v53 = vsel %vm346_vm2, %v3531_v51, 0 }
 0xae9   : > { %4821 = vmatmul.mubr.msk.bf16.vlgmr.msra.gmra.mxu1 %vm346_vm2, %v3229_v28 }
 0xaea   : > { %4831 = vmatpush3.bf16.xpose.msra.mxu1 %v3336_v29  ;;  %4832 = vmatprep.mubr.msk.bf16.mxu1 %vm5277_vm1, %v5276_v5  ;;  %v3481_v52 = vpop.permute.xlu0 %3480  ;;  %v3529_v48 = vpop.permute.xlu1 %3528 }
 0xaeb   : > { %4842 = vmatprep.subr.bf16.mxu1 %v5276_v5  ;;  %v3486_v36 = vsel %vm346_vm2, %v3481_v52, 0 }
 0xaed   : > { %4827 = vmatmul.mubr.msk.bf16.vlgmr.msra.gmra.mxu0 %vm346_vm2, %v3279_v16 }
 0xaee   : > { %4837 = vmatpush3.bf16.xpose.msra.mxu0 %v3386_v49  ;;  %4838 = vmatprep.mubr.msk.bf16.mxu0 %vm5277_vm1, %v5276_v5  ;;  %v3683_v42 = vpop.permute.xlu1 %3682  ;;  %v3479_v45 = vpop.permute.xlu0 %3478 }
 0xaef   : > { %4848 = vmatprep.subr.bf16.mxu0 %v5276_v5  ;;  %v3688_v54 = vsel %vm845_vm3, %v3683_v42, 0 }
 0xaf1   : > { %4833 = vmatmul.mubr.msk.bf16.vlgmr.msra.gmra.mxu1 %vm346_vm2, %v3329_v32 }
 0xaf2   : > { %4843 = vmatpush3.bf16.xpose.msra.mxu1 %v3436_v4  ;;  %4844 = vmatprep.mubr.msk.bf16.mxu1 %vm5277_vm1, %v5276_v5 }
 0xaf3   : > { %4854 = vmatprep.subr.bf16.mxu1 %v5276_v5 }
 0xaf5   : > { %4839 = vmatmul.mubr.msk.bf16.vlgmr.msra.gmra.mxu0 %vm346_vm2, %v3379_v39 }
 0xaf6   : > { %4849 = vmatpush3.bf16.xpose.msra.mxu0 %v3486_v36  ;;  %4850 = vmatprep.mubr.msk.bf16.mxu0 %vm5277_vm1, %v5276_v5 }
 0xaf7   : > { %4860 = vmatprep.subr.bf16.mxu0 %v5276_v5 }
 0xaf9   : > { %4845 = vmatmul.mubr.msk.bf16.vlgmr.msra.gmra.mxu1 %vm346_vm2, %v3429_v61 }
 0xafa   : > { %4855 = vmatpush3.bf16.xpose.msra.mxu1 %v3536_v53  ;;  %4856 = vmatprep.mubr.msk.bf16.mxu1 %vm5277_vm1, %v5276_v5 }
 0xafb   : > { %4866 = vmatprep.subr.bf16.mxu1 %v5276_v5 }
 0xafd   : > { %4851 = vmatmul.mubr.msk.bf16.vlgmr.msra.gmra.mxu0 %vm346_vm2, %v3479_v45 }
 0xafe   : > { %4861 = vmatpush3.bf16.msra.mxu0 %v3688_v54  ;;  %4862 = vmatprep.mubr.msk.bf16.mxu0 %vm5277_vm1, %v5276_v5 }
 0xaff   : > { %4872 = vmatprep.subr.bf16.mxu0 %v5276_v5 }
 0xb01   : > { %4857 = vmatmul.mubr.msk.bf16.vlgmr.msra.gmra.mxu1 %vm346_vm2, %v3529_v48 }
 0xb02   : > { %4868 = vmatprep.mubr.msk.bf16.mxu1 %vm5277_vm1, %v5276_v5 }
 0xb33   : > { %v6242_v50 = vpop.f32.mrf.mxu0 }
 0xb34   : > { %v6244_v57 = vpop.f32.mrf.mxu1 }
 0xb35   : > { %v4768_v47 = vpop.f32.mrf.mxu0 }
 0xb36   : > { %v4774_v33 = vpop.f32.mrf.mxu1 }
 0xb37   : > { %v2839_v11 = vpop.f32.mrf.mxu0 }
 0xb38   : > { %v2887_v0 = vpop.f32.mrf.mxu1 }
 0xb39   : > { %v4769_v21 = vpop.f32.mrf.mxu0 }
 0xb3a   : > { %v4775_v60 = vpop.f32.mrf.mxu1 }
 0xb3b   : > { %v6246_v8 = vpop.f32.mrf.mxu0 }
 0xb3c   : > { %v6248_v12 = vpop.f32.mrf.mxu1 }
 0xb3d   : > { %v4780_v6 = vpop.f32.mrf.mxu0 }
 0xb3e   : > { %v4786_v40 = vpop.f32.mrf.mxu1 }
 0xb3f   : > { %v2935_v35 = vpop.f32.mrf.mxu0 }
 0xb40   : > { %v2983_v24 = vpop.f32.mrf.mxu1 }
 0xb41   : > { %v4781_v26 = vpop.f32.mrf.mxu0 }
 0xb42   : > { %v4787_v27 = vpop.f32.mrf.mxu1 }
 0xb68   : > { %v6250_v25 = vpop.f32.mrf.mxu0 }
 0xb6a   : > { %v4792_v30 = vpop.f32.mrf.mxu0 }
 0xb6c   : > { %v3031_v28 = vpop.f32.mrf.mxu0  ;;  %v6252_v58 = vpop.f32.mrf.mxu1 }
 0xb6e   : > { %v4793_v14 = vpop.f32.mrf.mxu0  ;;  %v4798_v31 = vpop.f32.mrf.mxu1 }
 0xb70   : > { %v3079_v59 = vpop.f32.mrf.mxu1 }
 0xb72   : > { %v4799_v22 = vpop.f32.mrf.mxu1 }
 0xb9d   : > { %v6254_v38 = vpop.f32.mrf.mxu0 }
 0xb9f   : > { %v4804_v41 = vpop.f32.mrf.mxu0 }
 0xba1   : > { %v3127_v32 = vpop.f32.mrf.mxu0  ;;  %v6256_v34 = vpop.f32.mrf.mxu1 }
 0xba3   : > { %v4805_v9 = vpop.f32.mrf.mxu0  ;;  %v4810_v43 = vpop.f32.mrf.mxu1 }
 0xba5   : > { %v3175_v16 = vpop.f32.mrf.mxu1  ;;  %v3222_v37 = vpop.f32.mrf.mxu0 }
 0xba6   : > { %v3578_v56 = vmul.f32 0.35355338, %v3222_v37 }
 0xba7   : > { %v4811_v17 = vpop.f32.mrf.mxu1  ;;  %v4816_v20 = vpop.f32.mrf.mxu0 }
 0xba8   : > { %v3586_v61 = vsel %vm346_vm2, %v3578_v56, -inf }
 0xba9   : > { %3587 = vmax.xlane.f32.xlu0 %v3586_v61  ;;  %v3225_v29 = vpop.f32.mrf.mxu0  ;;  %v3272_v39 = vpop.f32.mrf.mxu1 }
 0xbaa   : > { %v3579_v49 = vmul.f32 0.35355338, %v3272_v39 }
 0xbab   : > { %v4817_v51 = vpop.f32.mrf.mxu0  ;;  %v4822_v4 = vpop.f32.mrf.mxu1 }
 0xbac   : > { %v3589_v52 = vsel %vm346_vm2, %v3579_v49, -inf }
 0xbad   : > { %v3322_v48 = vpop.f32.mrf.mxu0  ;;  %3590 = vmax.xlane.f32.xlu1 %v3589_v52  ;;  %v3275_v36 = vpop.f32.mrf.mxu1 }
 0xbae   : > { %v3580_v53 = vmul.f32 0.35355338, %v3322_v48 }
 0xbaf   : > { %v4823_v42 = vpop.f32.mrf.mxu1  ;;  %v4828_v45 = vpop.f32.mrf.mxu0 }
 0xbb0   : > { %v3592_v54 = vsel %vm346_vm2, %v3580_v53, -inf }
 0xbb1   : > { %3593 = vmax.xlane.f32.xlu0 %v3592_v54  ;;  %v3325_v47 = vpop.f32.mrf.mxu0  ;;  %v3372_v33 = vpop.f32.mrf.mxu1 }
 0xbb2   : > { %v3581_v11 = vmul.f32 0.35355338, %v3372_v33 }
 0xbb3   : > { %v4829_v0 = vpop.f32.mrf.mxu0  ;;  %v4834_v21 = vpop.f32.mrf.mxu1 }
 0xbb4   : > { %v3595_v60 = vsel %vm346_vm2, %v3581_v11, -inf }
 0xbb5   : > { %v3422_v6 = vpop.f32.mrf.mxu0  ;;  %3596 = vmax.xlane.f32.xlu0 %v3595_v60  ;;  %v3375_v40 = vpop.f32.mrf.mxu1 }
 0xbb6   : > { %v6262_v35 = vmul.f32 0.35355338, %v3422_v6 }
 0xbb7   : > { %v4835_v24 = vpop.f32.mrf.mxu1  ;;  %v4840_v26 = vpop.f32.mrf.mxu0 }
 0xbb8   : > { %v3598_v27 = vsel %vm346_vm2, %v6262_v35, -inf }
 0xbb9   : > { %v3425_v30 = vpop.f32.mrf.mxu0  ;;  %3599 = vmax.xlane.f32.xlu1 %v3598_v27  ;;  %v3472_v28 = vpop.f32.mrf.mxu1 }
 0xbba   : > { %v6266_v14 = vmul.f32 0.35355338, %v3472_v28 }
 0xbbb   : > { %v4841_v31 = vpop.f32.mrf.mxu0  ;;  %v4846_v59 = vpop.f32.mrf.mxu1 }
 0xbbc   : > { %v3601_v22 = vsel %vm346_vm2, %v6266_v14, -inf }
 0xbbd   : > { %v3522_v41 = vpop.f32.mrf.mxu0  ;;  %3602 = vmax.xlane.f32.xlu0 %v3601_v22  ;;  %v3475_v32 = vpop.f32.mrf.mxu1 }
 0xbbe   : > { %v3584_v9 = vmul.f32 0.35355338, %v3522_v41 }
 0xbbf   : > { %v4847_v43 = vpop.f32.mrf.mxu1  ;;  %v4852_v16 = vpop.f32.mrf.mxu0 }
 0xbc0   : > { %v3604_v37 = vsel %vm346_vm2, %v3584_v9, -inf }
 0xbc1   : > { %v3525_v17 = vpop.f32.mrf.mxu0  ;;  %3605 = vmax.xlane.f32.xlu1 %v3604_v37  ;;  %v3572_v20 = vpop.f32.mrf.mxu1 }
 0xbc2   : > { %v3585_v61 = vmul.f32 0.35355338, %v3572_v20 }
 0xbc3   : > { %v4853_v29 = vpop.f32.mrf.mxu0  ;;  %v4858_v39 = vpop.f32.mrf.mxu1 }
 0xbc4   : > { %v3607_v51 = vsel %vm346_vm2, %v3585_v61, -inf }
 0xbc5   : > { %3608 = vmax.xlane.f32.xlu0 %v3607_v51  ;;  %v3575_v4 = vpop.f32.mrf.mxu1 }
 0xbc7   : > { %v4859_v52 = vpop.f32.mrf.mxu1 }
 0xbd2   : > { %3778 = vrot.lane.b32.xlu1 %v5956_v46, %s5282_s25 }
 0xbd6   : > { %3826 = vrot.lane.b32.xlu1 %v5968_v63, %s5282_s25 }
 0xbdb   : > { %3730 = vrot.lane.b32.xlu0 %v5960_v62, %s5282_s25 }
 0xc32   : > { %v3588_v48 = vpop.xlane.xlu0 %3587 }
 0xc33   : > { %v3610_v36 = vsub.f32 %v3578_v56, %v3588_v48 }
 0xc35   : > { %v3618_v42 = vmul.f32 1.442695, %v3610_v36 }
 0xc36   : > { %v3591_v45 = vpop.xlane.xlu1 %3590 }
 0xc37   : > { %5089 = vpow2.f32 %v3618_v42  ;;  %v3611_v54 = vsub.f32 %v3579_v49, %v3591_v45 }
 0xc39   : > { %v3620_v47 = vmul.f32 1.442695, %v3611_v54 }
 0xc3a   : > { %v3594_v33 = vpop.xlane.xlu0 %3593 }
 0xc3b   : > { %5091 = vpow2.f32 %v3620_v47  ;;  %v3612_v0 = vsub.f32 %v3580_v53, %v3594_v33 }
 0xc3d   : > { %v3622_v21 = vmul.f32 1.442695, %v3612_v0 }
 0xc3e   : > { %v3597_v60 = vpop.xlane.xlu0 %3596 }
 0xc3f   : > { %5093 = vpow2.f32 %v3622_v21  ;;  %v3613_v46 = vsub.f32 %v3581_v11, %v3597_v60 }
 0xc41   : > { %v3624_v6 = vmul.f32 1.442695, %v3613_v46 }
 0xc42   : > { %v3600_v31 = vpop.xlane.xlu1 %3599 }
 0xc43   : > { %5095 = vpow2.f32 %v3624_v6  ;;  %v3614_v59 = vsub.f32 %v6262_v35, %v3600_v31 }
 0xc44   : > { %v6278_v63 = vpop.eup %5089 }
 0xc45   : > { %v3634_v62 = vsel %vm346_vm2, %v6278_v63, 0.0  ;;  %v3626_v32 = vmul.f32 1.442695, %v3614_v59 }
 0xc46   : > { %3635 = vadd.xlane.f32.xlu1 %v3634_v62  ;;  %v3603_v40 = vpop.xlane.xlu0 %3602 }
 0xc47   : > { %v3615_v41 = vsub.f32 %v6266_v14, %v3603_v40  ;;  %5097 = vpow2.f32 %v3626_v32 }
 0xc48   : > { %v6282_v56 = vpop.eup %5091 }
 0xc49   : > { %v3637_v49 = vsel %vm346_vm2, %v6282_v56, 0.0  ;;  %v3628_v16 = vmul.f32 1.442695, %v3615_v41 }
 0xc4a   : > { %3638 = vadd.xlane.f32.xlu0 %v3637_v49  ;;  %v3606_v22 = vpop.xlane.xlu1 %3605 }
 0xc4b   : > { %v3616_v43 = vsub.f32 %v3584_v9, %v3606_v22  ;;  %5099 = vpow2.f32 %v3628_v16 }
 0xc4c   : > { %v6286_v53 = vpop.eup %5093 }
 0xc4d   : > { %v3640_v11 = vsel %vm346_vm2, %v6286_v53, 0.0  ;;  %v3630_v37 = vmul.f32 1.442695, %v3616_v43 }
 0xc4e   : > { %3641 = vadd.xlane.f32.xlu1 %v3640_v11  ;;  %v3609_v24 = vpop.xlane.xlu0 %3608 }
 0xc4f   : > { %v3617_v17 = vsub.f32 %v3585_v61, %v3609_v24  ;;  %5101 = vpow2.f32 %v3630_v37 }
 0xc50   : > { %v6290_v26 = vpop.eup %5095 }
 0xc51   : > { %v3643_v27 = vsel %vm346_vm2, %v6290_v26, 0.0  ;;  %v3632_v20 = vmul.f32 1.442695, %v3617_v17 }
 0xc52   : > { %v3731_v30 = vpop.permute.xlu0 %3730  ;;  %3644 = vadd.xlane.f32.xlu0 %v3643_v27 }
 0xc53   : > { %v3736_v28 = vsel %vm845_vm3, %v3731_v30, 0  ;;  %5103 = vpow2.f32 %v3632_v20 }
 0xc54   : > { %4867 = vmatpush3.bf16.msra.mxu1 %v3736_v28 }
 0xc55   : > { %4878 = vmatprep.subr.bf16.mxu1 %v5276_v5 }
 0xc5f   : > { %3922 = vrot.lane.b32.xlu1 %v5992_v3, %s5282_s25  ;;  %v6302_v3 = vpop.eup %5097 }
 0xc60   : > { %v6304_v29 = vpop.eup %5099 }
 0xc61   : > { %v6308_v35 = vpop.eup %5101  ;;  %v3649_v14 = vsel %vm346_vm2, %v6304_v29, 0.0 }
 0xc62   : > { %v3652_v9 = vsel %vm346_vm2, %v6308_v35, 0.0  ;;  %v6314_v61 = vpop.eup %5103 }
 0xc63   : > { %v3655_v39 = vsel %vm346_vm2, %v6314_v61, 0.0 }
 0xc68   : > { %3874 = vrot.lane.b32.xlu0 %v5978_v7, %s5282_s25  ;;  %v3646_v7 = vsel %vm346_vm2, %v6302_v3, 0.0 }
 0xc83   : > { %3647 = vadd.xlane.f32.xlu1 %v3646_v7 }
 0xc87   : > { %3650 = vadd.xlane.f32.xlu0 %v3649_v14  ;;  %3653 = vadd.xlane.f32.xlu1 %v3652_v9 }
 0xc8b   : > { %3656 = vadd.xlane.f32.xlu0 %v3655_v39 }
 0xc98   : > { %4018 = vrot.lane.b32.xlu1 %v6000_v23, %s5282_s25  ;;  %v3779_v23 = vpop.permute.xlu1 %3778 }
 0xc9c   : > { %4116 = vrot.lane.b32.xlu1 %v5952_v44, %s5283_s29  ;;  %v3827_v44 = vpop.permute.xlu1 %3826 }
 0xc9d   : > { %v3832_v45 = vsel %vm845_vm3, %v3827_v44, 0 }
 0xca0   : > { %4120 = vrot.lane.b32.xlu1 %v5948_v15, %s5283_s29 }
 0xca1   : > { %3970 = vrot.lane.b32.xlu0 %v5988_v19, %s5282_s25 }
 0xca4   : > { %4124 = vrot.lane.b32.xlu1 %v5984_v10, %s5283_s29 }
 0xca5   : > { %4114 = vrot.lane.b32.xlu0 %v5942_v55, %s5283_s29 }
 0xca9   : > { %4118 = vrot.lane.b32.xlu0 %v5940_v18, %s5283_s29  ;;  %v3784_v18 = vsel %vm845_vm3, %v3779_v23, 0 }
 0xcad   : > { %4122 = vrot.lane.b32.xlu0 %v5974_v2, %s5283_s29 }
 0xccf   : > { %v3636_v51 = vpop.xlane.xlu1 %3635 }
 0xcd0   : > { %5105 = vrcp.f32 %v3636_v51 }
 0xcd3   : > { %v3639_v15 = vpop.xlane.xlu0 %3638 }
 0xcd4   : > { %5107 = vrcp.f32 %v3639_v15 }
 0xcd7   : > { %v3642_v4 = vpop.xlane.xlu1 %3641 }
 0xcd8   : > { %5109 = vrcp.f32 %v3642_v4 }
 0xcdb   : > { %v3645_v19 = vpop.xlane.xlu0 %3644  ;;  %v3923_v46 = vpop.permute.xlu1 %3922 }
 0xcdc   : > { %5111 = vrcp.f32 %v3645_v19 }
 0xcdd   : > { %v5106_v10 = vpop.eup %5105 }
 0xcde   : > { %v3666_v52 = vmul.f32 %v5106_v10, %v6278_v63  ;;  %v3928_v63 = vsel %vm845_vm3, %v3923_v46, 0 }
 0xcdf   : > { %v3875_v47 = vpop.permute.xlu0 %3874 }
 0xce0   : > { %v3674_v55 = vpack.c.bf16 %v3666_v52, %v3666_v52  ;;  %v3880_v60 = vsel %vm845_vm3, %v3875_v47, 0 }
 0xce1   : > { %v5108_v48 = vpop.eup %5107 }
 0xce2   : > { %v3667_v36 = vmul.f32 %v5108_v48, %v6282_v56  ;;  %4863 = vmatmul.mubr.msk.bf16.vlgmr.msra.gmra.mxu0 %vm346_vm2, %v3674_v55 }
 0xce3   : > { %4873 = vmatpush3.bf16.msra.mxu0 %v3784_v18  ;;  %4874 = vmatprep.mubr.msk.bf16.mxu0 %vm5277_vm1, %v5276_v5 }
 0xce4   : > { %v3675_v2 = vpack.c.bf16 %v3667_v36, %v3667_v36  ;;  %4884 = vmatprep.subr.bf16.mxu0 %v5276_v5 }
 0xce5   : > { %v5110_v42 = vpop.eup %5109 }
 0xce6   : > { %v3668_v54 = vmul.f32 %v5110_v42, %v6286_v53  ;;  %4869 = vmatmul.mubr.msk.bf16.vlgmr.msra.gmra.mxu1 %vm346_vm2, %v3675_v2 }
 0xce7   : > { %4879 = vmatpush3.bf16.msra.mxu1 %v3832_v45  ;;  %4880 = vmatprep.mubr.msk.bf16.mxu1 %vm5277_vm1, %v5276_v5 }
 0xce8   : > { %v3676_v33 = vpack.c.bf16 %v3668_v54, %v3668_v54  ;;  %4890 = vmatprep.subr.bf16.mxu1 %v5276_v5 }
 0xce9   : > { %v5112_v0 = vpop.eup %5111 }
 0xcea   : > { %v3669_v21 = vmul.f32 %v5112_v0, %v6290_v26  ;;  %4875 = vmatmul.mubr.msk.bf16.vlgmr.msra.gmra.mxu0 %vm346_vm2, %v3676_v33 }
 0xceb   : > { %4885 = vmatpush3.bf16.msra.mxu0 %v3880_v60  ;;  %4886 = vmatprep.mubr.msk.bf16.mxu0 %vm5277_vm1, %v5276_v5 }
 0xcec   : > { %v3677_v6 = vpack.c.bf16 %v3669_v21, %v3669_v21  ;;  %4896 = vmatprep.subr.bf16.mxu0 %v5276_v5 }
 0xcee   : > { %4881 = vmatmul.mubr.msk.bf16.vlgmr.msra.gmra.mxu1 %vm346_vm2, %v3677_v6 }
 0xcef   : > { %4891 = vmatpush3.bf16.msra.mxu1 %v3928_v63  ;;  %4892 = vmatprep.mubr.msk.bf16.mxu1 %vm5277_vm1, %v5276_v5 }
 0xcf0   : > { %4902 = vmatprep.subr.bf16.mxu1 %v5276_v5 }
 0xd0c   : > { %v3648_v62 = vpop.xlane.xlu1 %3647 }
 0xd0d   : > { %5113 = vrcp.f32 %v3648_v62 }
 0xd10   : > { %v3651_v56 = vpop.xlane.xlu0 %3650  ;;  %v3654_v49 = vpop.xlane.xlu1 %3653 }
 0xd11   : > { %5115 = vrcp.f32 %v3651_v56 }
 0xd12   : > { %5117 = vrcp.f32 %v3654_v49 }
 0xd14   : > { %v3657_v40 = vpop.xlane.xlu0 %3656  ;;  %v4019_v59 = vpop.permute.xlu1 %4018 }
 0xd15   : > { %5119 = vrcp.f32 %v3657_v40  ;;  %v4024_v43 = vsel %vm845_vm3, %v4019_v59, 0 }
 0xd18   : > { %v3971_v24 = vpop.permute.xlu0 %3970  ;;  %v4117_v63 = vpop.permute.xlu1 %4116 }
 0xd19   : > { %v3976_v31 = vsel %vm845_vm3, %v3971_v24, 0 }
 0xd1a   : > { %v5114_v53 = vpop.eup %5113 }
 0xd1b   : > { %v3670_v11 = vmul.f32 %v5114_v53, %v6302_v3 }
 0xd1c   : > { %v4115_v6 = vpop.permute.xlu0 %4114  ;;  %v4121_v56 = vpop.permute.xlu1 %4120 }
 0xd1d   : > { %v3678_v26 = vpack.c.bf16 %v3670_v11, %v3670_v11 }
 0xd1e   : > { %v5116_v27 = vpop.eup %5115 }
 0xd1f   : > { %v5118_v30 = vpop.eup %5117  ;;  %v3671_v28 = vmul.f32 %v5116_v27, %v6304_v29  ;;  %4887 = vmatmul.mubr.msk.bf16.vlgmr.msra.gmra.mxu0 %vm346_vm2, %v3678_v26 }
 0xd20   : > { %4897 = vmatpush3.bf16.msra.mxu0 %v3976_v31  ;;  %4898 = vmatprep.mubr.msk.bf16.mxu0 %vm5277_vm1, %v5276_v5  ;;  %v3672_v41 = vmul.f32 %v5118_v30, %v6308_v35  ;;  %v4119_v62 = vpop.permute.xlu0 %4118  ;;  %v4125_v40 = vpop.permute.xlu1 %4124 }
 0xd21   : > { %v3679_v22 = vpack.c.bf16 %v3671_v28, %v3671_v28 }
 0xd22   : > { %v5120_v32 = vpop.eup %5119  ;;  %v3680_v16 = vpack.c.bf16 %v3672_v41, %v3672_v41 }
 0xd23   : > { %4893 = vmatmul.mubr.msk.bf16.vlgmr.msra.gmra.mxu1 %vm346_vm2, %v3679_v22  ;;  %v3673_v37 = vmul.f32 %v5120_v32, %v6314_v61 }
 0xd24   : > { %4903 = vmatpush3.bf16.msra.mxu1 %v4024_v43  ;;  %4904 = vmatprep.mubr.msk.bf16.mxu1 %vm5277_vm1, %v5276_v5  ;;  %v4123_v49 = vpop.permute.xlu0 %4122 }
 0xd25   : > { %v3681_v17 = vpack.c.bf16 %v3673_v37, %v3673_v37 }
 0xd27   : > { %4899 = vmatmul.mubr.msk.bf16.vlgmr.msra.gmra.mxu0 %vm346_vm2, %v3680_v16 }
 0xd2b   : > { %4905 = vmatmul.mubr.msk.bf16.vlgmr.msra.gmra.mxu1 %vm346_vm2, %v3681_v17 }
 0xda2   : > { %v3724_v20 = vpop.f32.mrf.mxu0 }
 0xda3   : > { %4074 = vrot.lane.b32.xlu0 %v3724_v20, %s5284_s30 }
 0xda4   : > { %v4864_v3 = vpop.f32.mrf.mxu0 }
 0xda6   : > { %v3727_v29 = vpop.f32.mrf.mxu0  ;;  %v3772_v7 = vpop.f32.mrf.mxu1 }
 0xda7   : > { %4076 = vrot.lane.b32.xlu1 %v3772_v7, %s5284_s30 }
 0xda8   : > { %v4865_v35 = vpop.f32.mrf.mxu0  ;;  %v4870_v14 = vpop.f32.mrf.mxu1 }
 0xdaa   : > { %v3775_v9 = vpop.f32.mrf.mxu1  ;;  %v3820_v5 = vpop.f32.mrf.mxu0 }
 0xdab   : > { %4078 = vrot.lane.b32.xlu0 %v3820_v5, %s5284_s30 }
 0xdac   : > { %v4871_v61 = vpop.f32.mrf.mxu1  ;;  %v4876_v39 = vpop.f32.mrf.mxu0 }
 0xdae   : > { %v3823_v23 = vpop.f32.mrf.mxu0  ;;  %v3868_v44 = vpop.f32.mrf.mxu1 }
 0xdaf   : > { %4080 = vrot.lane.b32.xlu1 %v3868_v44, %s5284_s30 }
 0xdb0   : > { %v4877_v51 = vpop.f32.mrf.mxu0  ;;  %v4882_v15 = vpop.f32.mrf.mxu1 }
 0xdb2   : > { %v3871_v4 = vpop.f32.mrf.mxu1 }
 0xdb4   : > { %v4883_v19 = vpop.f32.mrf.mxu1 }
 0xddf   : > { %v3916_v10 = vpop.f32.mrf.mxu0 }
 0xde0   : > { %4082 = vrot.lane.b32.xlu0 %v3916_v10, %s5284_s30 }
 0xde1   : > { %v4888_v52 = vpop.f32.mrf.mxu0 }
 0xde3   : > { %v3919_v55 = vpop.f32.mrf.mxu0  ;;  %v3964_v48 = vpop.f32.mrf.mxu1 }
 0xde4   : > { %4084 = vrot.lane.b32.xlu1 %v3964_v48, %s5284_s30 }
 0xde5   : > { %v4889_v18 = vpop.f32.mrf.mxu0  ;;  %v4894_v36 = vpop.f32.mrf.mxu1 }
 0xde7   : > { %v3967_v2 = vpop.f32.mrf.mxu1  ;;  %v4012_v42 = vpop.f32.mrf.mxu0 }
 0xde8   : > { %4086 = vrot.lane.b32.xlu0 %v4012_v42, %s5284_s30 }
 0xde9   : > { %v4895_v45 = vpop.f32.mrf.mxu1  ;;  %v4900_v54 = vpop.f32.mrf.mxu0 }
 0xdeb   : > { %v4015_v47 = vpop.f32.mrf.mxu0  ;;  %v4060_v33 = vpop.f32.mrf.mxu1 }
 0xdec   : > { %4126 = vrot.lane.b32.xlu0 %v5972_v1, %s5283_s29  ;;  %4088 = vrot.lane.b32.xlu1 %v4060_v33, %s5284_s30 }
 0xded   : > { %v4901_v0 = vpop.f32.mrf.mxu0  ;;  %v4906_v21 = vpop.f32.mrf.mxu1 }
 0xdef   : > { %v4063_v60 = vpop.f32.mrf.mxu1 }
 0xdf0   : > { %4128 = vrot.lane.b32.xlu1 %v5980_v13, %s5283_s29 }
 0xdf1   : > { %v4907_v46 = vpop.f32.mrf.mxu1 }
 0xe15   : > { %v4075_v53 = vpop.permute.xlu0 %4074 }
 0xe16   : > { %v4098_v1 = vsel %vm346_vm2, %v6242_v50, %v4075_v53 }
 0xe17   : > { %v4138_v11 = vadd.f32 %v4115_v6, %v4098_v1 }
 0xe19   : > { %v4146_v24 = vmax.f32 %v4138_v11, 0.0  ;;  %v4077_v26 = vpop.permute.xlu1 %4076 }
 0xe1a   : > { %v4099_v27 = vsel %vm346_vm2, %v6244_v57, %v4077_v26 }
 0xe1b   : > { %4154 = vst.msk [vmem:[%s6389_s21] sm:$0xff] %vm257_vm0, %v4146_v24  ;;  %v4139_v13 = vadd.f32 %v4117_v63, %v4099_v27 }
 0xe1d   : > { %v4147_v30 = vmax.f32 %v4139_v13, 0.0  ;;  %v4079_v28 = vpop.permute.xlu0 %4078 }
 0xe1e   : > { %v4100_v50 = vsel %vm346_vm2, %v6246_v8, %v4079_v28 }
 0xe1f   : > { %4155 = vst.msk [vmem:[%s6389_s21 + $0x8] sm:$0xff] %vm257_vm0, %v4147_v30  ;;  %v4140_v31 = vadd.f32 %v4119_v62, %v4100_v50 }
 0xe21   : > { %v4148_v59 = vmax.f32 %v4140_v31, 0.0  ;;  %v4081_v57 = vpop.permute.xlu1 %4080 }
 0xe22   : > { %v4101_v22 = vsel %vm346_vm2, %v6248_v12, %v4081_v57 }
 0xe23   : > { %4156 = vst.msk [vmem:[%s6389_s21 + $0x10] sm:$0xff] %vm257_vm0, %v4148_v59  ;;  %v4141_v41 = vadd.f32 %v4121_v56, %v4101_v22 }
 0xe25   : > { %v4149_v32 = vmax.f32 %v4141_v41, 0.0 }
 0xe27   : > { %4157 = vst.msk [vmem:[%s6389_s21 + $0x18] sm:$0xff] %vm257_vm0, %v4149_v32 }
 0xe52   : > { %v4083_v43 = vpop.permute.xlu0 %4082 }
 0xe53   : > { %v4102_v8 = vsel %vm346_vm2, %v6250_v25, %v4083_v43 }
 0xe54   : > { %v4142_v16 = vadd.f32 %v4123_v49, %v4102_v8 }
 0xe56   : > { %v4150_v37 = vmax.f32 %v4142_v16, 0.0  ;;  %v4085_v17 = vpop.permute.xlu1 %4084 }
 0xe57   : > { %v4103_v20 = vsel %vm346_vm2, %v6252_v58, %v4085_v17 }
 0xe58   : > { %4158 = vst.msk [vmem:[%s6389_s21 + $0x20] sm:$0xff] %vm257_vm0, %v4150_v37  ;;  %v4143_v12 = vadd.f32 %v4125_v40, %v4103_v20 }
 0xe5a   : > { %v4151_v3 = vmax.f32 %v4143_v12, 0.0  ;;  %v4087_v29 = vpop.permute.xlu0 %4086 }
 0xe5b   : > { %v4104_v25 = vsel %vm346_vm2, %v6254_v38, %v4087_v29 }
 0xe5c   : > { %4159 = vst.msk [vmem:[%s6389_s21 + $0x28] sm:$0xff] %vm257_vm0, %v4151_v3 }
 0xe5e   : > { %v4127_v7 = vpop.permute.xlu0 %4126  ;;  %v4089_v35 = vpop.permute.xlu1 %4088 }
 0xe5f   : > { %v4144_v14 = vadd.f32 %v4127_v7, %v4104_v25  ;;  %v4105_v58 = vsel %vm346_vm2, %v6256_v34, %v4089_v35 }
 0xe61   : > { %v4152_v9 = vmax.f32 %v4144_v14, 0.0 }
 0xe62   : > { %v4129_v5 = vpop.permute.xlu1 %4128 }
 0xe63   : > { %4160 = vst.msk [vmem:[%s6389_s21 + $0x30] sm:$0xff] %vm257_vm0, %v4152_v9  ;;  %v4145_v61 = vadd.f32 %v4129_v5, %v4105_v58 }
 0xe65   : > { %v4153_v38 = vmax.f32 %v4145_v61, 0.0 }
 0xe67   : > { %4161 = vst.msk [vmem:[%s6389_s21 + $0x38] sm:$0xff] %vm257_vm0, %v4153_v38 }
 0xe68   : > { %5214 = shalt.err (!%p5211_p3)
}
 0xe69   : > { %s5215_s20 = scalar_lea.hbm %s6422_s26, 1024  ;;  %s5219_s25 = scalar_lea.hbm %s6473_s3, 2048 }
 0xe6a   : > { %p5216_p11 = scmp.ne.s32.totalorder %s6422_s26, %s5215_s20  ;;  %p5220_p4 = scmp.lt.s32.totalorder %s6422_s26, %s6473_s3 }
 0xe6b   : > { %p5221_p6 = scmp.lt.s32.totalorder %s5219_s25, %s5215_s20 }
 0xe6c   : > { %p5217_p9 = pnand %p5216_p11, %p6488_p2 }
 0xe6d   : > { %p5222_p8 = por %p5221_p6, %p5220_p4 }
 0xe6e   : > { %p5218_p1 = pneg %p5217_p9 }
 0xe70   : > { %p5223_p5 = pnand %p5222_p8, %p5218_p1 }
 0xe72   : > { %5226 = shalt.err (!%p5223_p5)
}
 0xe73   : > { %s5286_s21 = smov 128  }
 0xe74   : > { %4918 = dma.vmem_to_hbm [thread:$0]  (%p6488_p2), %s6424_s17, 1024, %s6422_s26, %s4163_s16, %s5286_s21, %s5286_s21, %s5284_s30  }
 0xe75 PF: > { %s4191_s22 = sand.u32 1, %s5257_s12   ;;  %p6489_p7 = scmp.ne.s32.totalorder %s6479_s19, 0 }
 0xe76   : > { %p6490_p12 = scmp.ge.s32.totalorder %s5269_s15, 2  ;;  %s4192_s23 = scalar_lea.sflag [#allocation4], %s4191_s22 }
 0xe78   : > { %p4932_p13 = pnand %p6490_p12, %p6489_p7 }
 0xe7a   : > { %p4933_p0 = pneg %p4932_p13 }
 0xe7c   : > { %5252 = dma.done.wait (%p4933_p0), %s4192_s23, 1024  }
 0xe7d   : > { %5254 = vsyncadd (%p4933_p0), %s4192_s23, 4294966272  ;;  %p17_p10 = scmp.ge.s32.totalorder %s5385_s7, 4   ;;  %s6491_s12 = smov %s5261_s13 }
 0xe7e   : > { %s6492_s13 = smov %s5265_s14  ;;  %s6493_s14 = smov %s5401_s11 }
 0xe7f   : > { %s6494_s15 = smov %s5385_s7  ;;  %19 = sbr.rel (!%p17_p10) target bundleno = 6 (0x6), region = 85 }
 0xe84   :  { %4197 = vsyncpa [#allocation3], 1 }
 0xe85   :  { %4199 = vsyncpa [#allocation3 + $0x1], 1 }
 0xe86   :  { %4200 = vsyncpa [#allocation6], 1 }
 0xe87   :  { %4201 = vsyncpa [#allocation4], 1 }
 0xe88   :  { %4203 = vsyncpa [#allocation4 + $0x1], 1 }

</bundles_post_ra>
